<compile_context>
chip_gen: v7x
topology: tpu7x:2x2x1
jax: 0.10.0
libtpu: 0.0.40
codegen_flags: <defaults>
</compile_context>

<pallas_src>
import math

import numpy as np
import jax
import jax.numpy as jnp
from jax.experimental import pallas as pl
from jax.experimental.pallas import tpu as pltpu


def _context_aware_attention_kernel(
    q_ref, k_ref, v_ref, ctx_ref, mask_ref,
    u_ref, g_ref, w_ref, b_ref,
    out_ref,
):
    Bt, Sq, D = q_ref.shape
    _, Sk, _ = k_ref.shape
    C = ctx_ref.shape[-1]
    Mq = Bt * Sq
    Mk = Bt * Sk

    f32 = jnp.float32
    bf16 = jnp.bfloat16

    # Flatten the batch tile into rows so every matmul is full-width on the MXU.
    q2 = q_ref[...].reshape(Mq, D)           # f32
    k2 = k_ref[...].reshape(Mk, D)           # f32
    v2 = v_ref[...].reshape(Mk, D)           # f32
    ctx2 = ctx_ref[...].reshape(Mk, C)       # f32

    # --- gating (hoisted): lam = sigmoid(k.w1 + ctx.(u@w2)) ------------------
    # gk/gv were folded in the wrapper (exact f32), so the gate work is pure
    # VPU multiply + XLU lane-reduce and does NOT wait on the context matmul.
    g = g_ref[...]                            # (4, max(D,C)) f32
    lam_k = jax.nn.sigmoid(
        jnp.sum(k2 * g[0:1, :D], axis=-1, keepdims=True)
        + jnp.sum(ctx2 * g[2:3, :C], axis=-1, keepdims=True))
    lam_v = jax.nn.sigmoid(
        jnp.sum(v2 * g[1:2, :D], axis=-1, keepdims=True)
        + jnp.sum(ctx2 * g[3:4, :C], axis=-1, keepdims=True))

    # --- context projections: u_k | u_v packed as (C, 2D), one matmul --------
    kv_ctx = jnp.dot(ctx2.astype(bf16), u_ref[...],
                     preferred_element_type=f32)             # (Mk, 2D)
    key_ctx = kv_ctx[:, :D]
    val_ctx = kv_ctx[:, D:]

    # blend: (1-lam)*x + lam*x_ctx
    k_cap = k2 + lam_k * (key_ctx - k2)
    v_cap = v2 + lam_v * (val_ctx - v2)

    # --- single-head MHA projections (packed weights, bf16 MXU, f32 accum) ---
    w = w_ref[...]                                            # (D, 4D) bf16
    b = b_ref[...]                                            # (4, D)  f32
    qp = jnp.dot(q2.astype(bf16), w[:, 0 * D:1 * D],
                 preferred_element_type=f32) + b[0:1, :]      # wq/bq pre-scaled
    kp = jnp.dot(k_cap.astype(bf16), w[:, 1 * D:2 * D],
                 preferred_element_type=f32) + b[1:2, :]
    vp = jnp.dot(v_cap.astype(bf16), w[:, 2 * D:3 * D],
                 preferred_element_type=f32) + b[3 - 2:3, :] if False else \
         jnp.dot(v_cap.astype(bf16), w[:, 2 * D:3 * D],
                 preferred_element_type=f32) + b[2:3, :]

    # --- flattened attention core: two full-width MXU matmuls ----------------
    # scores (Mq, Mk): contract minor dims of both operands (no explicit kp.T)
    s = jax.lax.dot_general(
        qp.astype(bf16), kp.astype(bf16),
        dimension_numbers=(((1,), (1,)), ((), ())),
        preferred_element_type=f32)                           # (Mq, Mk)

    # block-diagonal additive mask (0 in-batch, -1e30 cross-batch) applied
    # BEFORE max/exp so cross-batch keys never enter the normalizer.
    s = s + mask_ref[...]

    s = s - jnp.max(s, axis=-1, keepdims=True)
    p = jnp.exp(s)
    p = p * pl.reciprocal(jnp.sum(p, axis=-1, keepdims=True), approx=True)

    attn = jnp.dot(p.astype(bf16), vp.astype(bf16),
                   preferred_element_type=f32)                # (Mq, D)

    out2 = jnp.dot(attn.astype(bf16), w[:, 3 * D:4 * D],
                   preferred_element_type=f32) + b[3:4, :]
    out_ref[...] = out2.reshape(Bt, Sq, D).astype(out_ref.dtype)


def context_aware_attention(q, k, v, context, packed, *, bt=8):
    """q:(B,Sq,D) k,v:(B,Sk,D) context:(B,Sk,C) -> (B,Sq,D).

    bt = batch tile per grid step. Pick bt=8 (grid even) on v7x so both
    TensorCores get a step; bt=16 (grid=1, 256 MXU rows) on v5e/v6e.
    """
    B, Sq, D = q.shape
    _, Sk, C = context.shape
    bt = min(bt, B)
    assert B % bt == 0, "batch must be divisible by the batch tile"

    u_pack, gate_pack, w_pack, b_pack = packed

    # Block-diagonal additive mask for the flattened (bt*Sq, bt*Sk) score tile.
    # Constant across grid steps -> Pallas skips re-DMA after the first step.
    rb = np.arange(bt * Sq) // Sq
    cb = np.arange(bt * Sk) // Sk
    mask = jnp.asarray(
        np.where(rb[:, None] == cb[None, :], 0.0, -1e30).astype(np.float32))

    batched = lambda s: pl.BlockSpec((bt,) + s, lambda i: (i, 0, 0))
    full = lambda arr: pl.BlockSpec(arr.shape, lambda i: (0,) * arr.ndim)

    return pl.pallas_call(
        _context_aware_attention_kernel,
        out_shape=jax.ShapeDtypeStruct((B, Sq, D), q.dtype),
        grid_spec=pltpu.PrefetchScalarGridSpec(
            num_scalar_prefetch=0,
            grid=(B // bt,),
            in_specs=[
                batched((Sq, D)),    # q
                batched((Sk, D)),    # k
                batched((Sk, D)),    # v
                batched((Sk, C)),    # context
                full(mask),          # (bt*Sq, bt*Sk) f32 additive mask
                full(u_pack),        # (C, 2D)  bf16
                full(gate_pack),     # (4, max(D,C)) f32
                full(w_pack),        # (D, 4D)  bf16 (wq pre-scaled)
                full(b_pack),        # (4, D)   f32 (bq pre-scaled)
            ],
            out_specs=batched((Sq, D)),
        ),
        compiler_params=pltpu.CompilerParams(
            dimension_semantics=("parallel",)),
    )(q, k, v, context, mask, u_pack, gate_pack, w_pack, b_pack)


def init_params(key, dim_model, dim_context):
    """Deterministic synthetic parameters matching the PyTorch module shapes.

    nn.Linear stores weight as (out, in); we pre-transpose so `x @ W` works.
    """
    ks = jax.random.split(key, 10)
    D, C = dim_model, dim_context

    def w(k, shape, scale=0.1):
        return (scale * jax.random.normal(k, shape)).astype(jnp.float32)

    in_proj_weight = w(ks[0], (3 * D, D))   # MHA packed in_proj
    in_proj_bias = w(ks[1], (3 * D,))
    out_proj_weight = w(ks[2], (D, D))
    out_proj_bias = w(ks[3], (D,))

    return {
        # context projections (Linear(C->D, bias=False)): stored transposed (C, D)
        "u_k": w(ks[4], (D, C)).T,
        "u_v": w(ks[5], (D, C)).T,
        # gate projections (Linear(D->1, bias=False)): stored transposed (D, 1)
        "w1_k": w(ks[6], (1, D)).T,
        "w2_k": w(ks[7], (1, D)).T,
        "w1_v": w(ks[8], (1, D)).T,
        "w2_v": w(ks[9], (1, D)).T,
        # MHA projections, transposed to (D, D); biases 2-D (1, D)
        "wq": in_proj_weight[:D].T,
        "wk": in_proj_weight[D:2 * D].T,
        "wv": in_proj_weight[2 * D:].T,
        "bq": in_proj_bias[:D].reshape(1, D),
        "bk": in_proj_bias[D:2 * D].reshape(1, D),
        "bv": in_proj_bias[2 * D:].reshape(1, D),
        "wo": out_proj_weight.T,
        "bo": out_proj_bias.reshape(1, D),
    }


def pack_params(p, dim_model):
    """Pack the 14 logical params into 4 kernel inputs.

    Folds the softmax 1/sqrt(D) into wq/bq and algebraically hoists the
    context-gate projection: gk = u_k @ w2_k, gv = u_v @ w2_v (exact, f32).
    """
    D = dim_model
    C = p["u_k"].shape[0]
    scale = 1.0 / math.sqrt(D)

    u_pack = jnp.concatenate([p["u_k"], p["u_v"]], axis=1).astype(jnp.bfloat16)  # (C, 2D)

    gk = (p["u_k"] @ p["w2_k"])[:, 0]        # (C,)  exact f32
    gv = (p["u_v"] @ p["w2_v"])[:, 0]        # (C,)
    W = max(D, C)
    pad = lambda x: jnp.pad(x, (0, W - x.shape[0]))
    gate_pack = jnp.stack(
        [pad(p["w1_k"][:, 0]), pad(p["w1_v"][:, 0]), pad(gk), pad(gv)],
        axis=0).astype(jnp.float32)                                              # (4, W)

    w_pack = jnp.concatenate(
        [p["wq"] * scale, p["wk"], p["wv"], p["wo"]], axis=1).astype(jnp.bfloat16)  # (D, 4D)
    b_pack = jnp.concatenate(
        [p["bq"] * scale, p["bk"], p["bv"], p["bo"]], axis=0).astype(jnp.float32)   # (4, D)
    return u_pack, gate_pack, w_pack, b_pack


def reference_forward(q, k, v, context, p):
    """Pure-JAX f32 reference mirroring the PyTorch forward (for validation)."""
    key_ctx = context @ p["u_k"]
    val_ctx = context @ p["u_v"]
    lam_k = jax.nn.sigmoid(k @ p["w1_k"] + key_ctx @ p["w2_k"])
    lam_v = jax.nn.sigmoid(v @ p["w1_v"] + val_ctx @ p["w2_v"])
    k_cap = (1 - lam_k) * k + lam_k * key_ctx
    v_cap = (1 - lam_v) * v + lam_v * val_ctx
    qp = q @ p["wq"] + p["bq"]
    kp = k_cap @ p["wk"] + p["bk"]
    vp = v_cap @ p["wv"] + p["bv"]
    scale = 1.0 / math.sqrt(q.shape[-1])
    scores = jnp.einsum("bqd,bkd->bqk", qp, kp) * scale
    attn = jax.nn.softmax(scores, axis=-1)
    out = jnp.einsum("bqk,bkd->bqd", attn, vp)
    return out @ p["wo"] + p["bo"]


if __name__ == "__main__":
    # Lane-dense D=128, full-8-sublane Sq/Sk. bt=8 -> flattened 128-row matmuls,
    # 128x128 lane-dense score tile, grid=2 (even, so both v7x TCs get a step).
    # On single-TC chips (v5e/v6e) bt=16 (grid=1) is the recommended setting.
    B, Sq, Sk, D, C = 16, 16, 16, 128, 64
    BT = 8

    key = jax.random.PRNGKey(0)
    kq, kk, kv, kc, kp = jax.random.split(key, 5)
    q = jax.random.normal(kq, (B, Sq, D), dtype=jnp.float32)
    k = jax.random.normal(kk, (B, Sk, D), dtype=jnp.float32)
    v = jax.random.normal(kv, (B, Sk, D), dtype=jnp.float32)
    context = jax.random.normal(kc, (B, Sk, C), dtype=jnp.float32)

    params = init_params(kp, D, C)
    packed = pack_params(params, D)

    out = context_aware_attention(q, k, v, context, packed, bt=BT)
    out = jax.block_until_ready(out)

    ref = jax.block_until_ready(reference_forward(q, k, v, context, params))
    assert out.shape == (B, Sq, D)
    # bf16 MXU operands + approx reciprocal -> relaxed tolerance vs f32 reference.
    rel_err = jnp.linalg.norm(out - ref) / jnp.linalg.norm(ref)
    assert rel_err < 3e-2, f"mismatch vs JAX reference: rel_err={rel_err}"

    print("KERNEL_OK")
</pallas_src>

<mosaic_0001>
module attributes {stable_mosaic.version = 11 : i64} {
  func.func @_context_aware_attention_kernel(%arg0: i32, %arg1: memref<8x16x128xf32, #tpu.memory_space<vmem>>, %arg2: memref<8x16x128xf32, #tpu.memory_space<vmem>>, %arg3: memref<8x16x128xf32, #tpu.memory_space<vmem>>, %arg4: memref<8x16x64xf32, #tpu.memory_space<vmem>>, %arg5: memref<128x128xf32, #tpu.memory_space<vmem>>, %arg6: memref<64x256xbf16, #tpu.memory_space<vmem>>, %arg7: memref<4x128xf32, #tpu.memory_space<vmem>>, %arg8: memref<128x512xbf16, #tpu.memory_space<vmem>>, %arg9: memref<4x128xf32, #tpu.memory_space<vmem>>, %arg10: memref<8x16x128xf32, #tpu.memory_space<vmem>>) attributes {dimension_semantics = [#tpu.dimension_semantics<parallel>], iteration_bounds = array<i64: 2>, scalar_prefetch = 0 : i64, scratch_operands = 0 : i64, tpu.core_type = #tpu.core_type<tc>, window_params = [{transform_indices = @transform_0, window_bounds = array<i64: 8, 16, 128>}, {transform_indices = @transform_1, window_bounds = array<i64: 8, 16, 128>}, {transform_indices = @transform_2, window_bounds = array<i64: 8, 16, 128>}, {transform_indices = @transform_3, window_bounds = array<i64: 8, 16, 64>}, {pipeline_mode = #tpu.pipeline_mode<synchronous>, transform_indices = @transform_4, window_bounds = array<i64: 128, 128>}, {pipeline_mode = #tpu.pipeline_mode<synchronous>, transform_indices = @transform_5, window_bounds = array<i64: 64, 256>}, {pipeline_mode = #tpu.pipeline_mode<synchronous>, transform_indices = @transform_6, window_bounds = array<i64: 4, 128>}, {pipeline_mode = #tpu.pipeline_mode<synchronous>, transform_indices = @transform_7, window_bounds = array<i64: 128, 512>}, {pipeline_mode = #tpu.pipeline_mode<synchronous>, transform_indices = @transform_8, window_bounds = array<i64: 4, 128>}, {transform_indices = @transform_9, window_bounds = array<i64: 8, 16, 128>}]} {
    %c0 = arith.constant 0 : index
    %c0_0 = arith.constant 0 : index
    %c0_1 = arith.constant 0 : index
    %0 = vector.load %arg1[%c0, %c0_0, %c0_1] : memref<8x16x128xf32, #tpu.memory_space<vmem>>, vector<8x16x128xf32>
    %1 = vector.shape_cast %0 : vector<8x16x128xf32> to vector<128x128xf32>
    %c0_2 = arith.constant 0 : index
    %c0_3 = arith.constant 0 : index
    %c0_4 = arith.constant 0 : index
    %2 = vector.load %arg2[%c0_2, %c0_3, %c0_4] : memref<8x16x128xf32, #tpu.memory_space<vmem>>, vector<8x16x128xf32>
    %3 = vector.shape_cast %2 : vector<8x16x128xf32> to vector<128x128xf32>
    %c0_5 = arith.constant 0 : index
    %c0_6 = arith.constant 0 : index
    %c0_7 = arith.constant 0 : index
    %4 = vector.load %arg3[%c0_5, %c0_6, %c0_7] : memref<8x16x128xf32, #tpu.memory_space<vmem>>, vector<8x16x128xf32>
    %5 = vector.shape_cast %4 : vector<8x16x128xf32> to vector<128x128xf32>
    %c0_8 = arith.constant 0 : index
    %c0_9 = arith.constant 0 : index
    %c0_10 = arith.constant 0 : index
    %6 = vector.load %arg4[%c0_8, %c0_9, %c0_10] : memref<8x16x64xf32, #tpu.memory_space<vmem>>, vector<8x16x64xf32>
    %7 = vector.shape_cast %6 : vector<8x16x64xf32> to vector<128x64xf32>
    %c0_11 = arith.constant 0 : index
    %c0_12 = arith.constant 0 : index
    %8 = vector.load %arg7[%c0_11, %c0_12] : memref<4x128xf32, #tpu.memory_space<vmem>>, vector<4x128xf32>
    %9 = vector.extract_strided_slice %8 {offsets = [0, 0], sizes = [1, 128], strides = [1, 1]} : vector<4x128xf32> to vector<1x128xf32>
    %10 = vector.broadcast %9 : vector<1x128xf32> to vector<128x128xf32>
    %11 = arith.mulf %3, %10 : vector<128x128xf32>
    %cst = arith.constant dense<0.000000e+00> : vector<128xf32>
    %12 = vector.multi_reduction <add>, %11, %cst [1] : vector<128x128xf32> to vector<128xf32>
    %13 = vector.shape_cast %12 : vector<128xf32> to vector<128x1xf32>
    %14 = vector.extract_strided_slice %8 {offsets = [2, 0], sizes = [1, 64], strides = [1, 1]} : vector<4x128xf32> to vector<1x64xf32>
    %15 = vector.broadcast %14 : vector<1x64xf32> to vector<128x64xf32>
    %16 = arith.mulf %7, %15 : vector<128x64xf32>
    %cst_13 = arith.constant dense<0.000000e+00> : vector<128xf32>
    %17 = vector.multi_reduction <add>, %16, %cst_13 [1] : vector<128x64xf32> to vector<128xf32>
    %18 = vector.shape_cast %17 : vector<128xf32> to vector<128x1xf32>
    %19 = arith.addf %13, %18 : vector<128x1xf32>
    %20 = arith.negf %19 : vector<128x1xf32>
    %21 = math.exp %20 : vector<128x1xf32>
    %cst_14 = arith.constant 1.000000e+00 : f32
    %22 = vector.broadcast %cst_14 : f32 to vector<128x1xf32>
    %23 = arith.addf %22, %21 : vector<128x1xf32>
    %24 = arith.divf %22, %23 : vector<128x1xf32>
    %25 = vector.extract_strided_slice %8 {offsets = [1, 0], sizes = [1, 128], strides = [1, 1]} : vector<4x128xf32> to vector<1x128xf32>
    %26 = vector.broadcast %25 : vector<1x128xf32> to vector<128x128xf32>
    %27 = arith.mulf %5, %26 : vector<128x128xf32>
    %cst_15 = arith.constant dense<0.000000e+00> : vector<128xf32>
    %28 = vector.multi_reduction <add>, %27, %cst_15 [1] : vector<128x128xf32> to vector<128xf32>
    %29 = vector.shape_cast %28 : vector<128xf32> to vector<128x1xf32>
    %30 = vector.extract_strided_slice %8 {offsets = [3, 0], sizes = [1, 64], strides = [1, 1]} : vector<4x128xf32> to vector<1x64xf32>
    %31 = vector.broadcast %30 : vector<1x64xf32> to vector<128x64xf32>
    %32 = arith.mulf %7, %31 : vector<128x64xf32>
    %cst_16 = arith.constant dense<0.000000e+00> : vector<128xf32>
    %33 = vector.multi_reduction <add>, %32, %cst_16 [1] : vector<128x64xf32> to vector<128xf32>
    %34 = vector.shape_cast %33 : vector<128xf32> to vector<128x1xf32>
    %35 = arith.addf %29, %34 : vector<128x1xf32>
    %36 = arith.negf %35 : vector<128x1xf32>
    %37 = math.exp %36 : vector<128x1xf32>
    %cst_17 = arith.constant 1.000000e+00 : f32
    %38 = vector.broadcast %cst_17 : f32 to vector<128x1xf32>
    %39 = arith.addf %38, %37 : vector<128x1xf32>
    %40 = arith.divf %38, %39 : vector<128x1xf32>
    %41 = arith.truncf %7 : vector<128x64xf32> to vector<128x64xbf16>
    %c0_18 = arith.constant 0 : index
    %c0_19 = arith.constant 0 : index
    %42 = vector.load %arg6[%c0_18, %c0_19] : memref<64x256xbf16, #tpu.memory_space<vmem>>, vector<64x256xbf16>
    %cst_20 = arith.constant dense<0.000000e+00> : vector<128x256xf32>
    %43 = tpu.matmul %41, %42, %cst_20 {dimension_numbers = #tpu.dot_dimension_numbers<[1], [0], [0], [1], [0, 0, 1, 1], [], []>} : vector<128x64xbf16>, vector<64x256xbf16>, vector<128x256xf32> -> vector<128x256xf32>
    %44 = vector.extract_strided_slice %43 {offsets = [0, 0], sizes = [128, 128], strides = [1, 1]} : vector<128x256xf32> to vector<128x128xf32>
    %45 = vector.extract_strided_slice %43 {offsets = [0, 128], sizes = [128, 128], strides = [1, 1]} : vector<128x256xf32> to vector<128x128xf32>
    %46 = arith.subf %44, %3 : vector<128x128xf32>
    %47 = vector.broadcast %24 : vector<128x1xf32> to vector<128x128xf32>
    %48 = arith.mulf %47, %46 : vector<128x128xf32>
    %49 = arith.addf %3, %48 : vector<128x128xf32>
    %50 = arith.subf %45, %5 : vector<128x128xf32>
    %51 = vector.broadcast %40 : vector<128x1xf32> to vector<128x128xf32>
    %52 = arith.mulf %51, %50 : vector<128x128xf32>
    %53 = arith.addf %5, %52 : vector<128x128xf32>
    %c0_21 = arith.constant 0 : index
    %c0_22 = arith.constant 0 : index
    %54 = vector.load %arg8[%c0_21, %c0_22] : memref<128x512xbf16, #tpu.memory_space<vmem>>, vector<128x512xbf16>
    %c0_23 = arith.constant 0 : index
    %c0_24 = arith.constant 0 : index
    %55 = vector.load %arg9[%c0_23, %c0_24] : memref<4x128xf32, #tpu.memory_space<vmem>>, vector<4x128xf32>
    %56 = arith.truncf %1 : vector<128x128xf32> to vector<128x128xbf16>
    %57 = vector.extract_strided_slice %54 {offsets = [0, 0], sizes = [128, 128], strides = [1, 1]} : vector<128x512xbf16> to vector<128x128xbf16>
    %cst_25 = arith.constant dense<0.000000e+00> : vector<128x128xf32>
    %58 = tpu.matmul %56, %57, %cst_25 {dimension_numbers = #tpu.dot_dimension_numbers<[1], [0], [0], [1], [0, 0, 1, 1], [], []>} : vector<128x128xbf16>, vector<128x128xbf16>, vector<128x128xf32> -> vector<128x128xf32>
    %59 = vector.extract_strided_slice %55 {offsets = [0, 0], sizes = [1, 128], strides = [1, 1]} : vector<4x128xf32> to vector<1x128xf32>
    %60 = vector.broadcast %59 : vector<1x128xf32> to vector<128x128xf32>
    %61 = arith.addf %58, %60 : vector<128x128xf32>
    %62 = arith.truncf %49 : vector<128x128xf32> to vector<128x128xbf16>
    %63 = vector.extract_strided_slice %54 {offsets = [0, 128], sizes = [128, 128], strides = [1, 1]} : vector<128x512xbf16> to vector<128x128xbf16>
    %cst_26 = arith.constant dense<0.000000e+00> : vector<128x128xf32>
    %64 = tpu.matmul %62, %63, %cst_26 {dimension_numbers = #tpu.dot_dimension_numbers<[1], [0], [0], [1], [0, 0, 1, 1], [], []>} : vector<128x128xbf16>, vector<128x128xbf16>, vector<128x128xf32> -> vector<128x128xf32>
    %65 = vector.extract_strided_slice %55 {offsets = [1, 0], sizes = [1, 128], strides = [1, 1]} : vector<4x128xf32> to vector<1x128xf32>
    %66 = vector.broadcast %65 : vector<1x128xf32> to vector<128x128xf32>
    %67 = arith.addf %64, %66 : vector<128x128xf32>
    %68 = arith.truncf %53 : vector<128x128xf32> to vector<128x128xbf16>
    %69 = vector.extract_strided_slice %54 {offsets = [0, 256], sizes = [128, 128], strides = [1, 1]} : vector<128x512xbf16> to vector<128x128xbf16>
    %cst_27 = arith.constant dense<0.000000e+00> : vector<128x128xf32>
    %70 = tpu.matmul %68, %69, %cst_27 {dimension_numbers = #tpu.dot_dimension_numbers<[1], [0], [0], [1], [0, 0, 1, 1], [], []>} : vector<128x128xbf16>, vector<128x128xbf16>, vector<128x128xf32> -> vector<128x128xf32>
    %71 = vector.extract_strided_slice %55 {offsets = [2, 0], sizes = [1, 128], strides = [1, 1]} : vector<4x128xf32> to vector<1x128xf32>
    %72 = vector.broadcast %71 : vector<1x128xf32> to vector<128x128xf32>
    %73 = arith.addf %70, %72 : vector<128x128xf32>
    %74 = arith.truncf %61 : vector<128x128xf32> to vector<128x128xbf16>
    %75 = arith.truncf %67 : vector<128x128xf32> to vector<128x128xbf16>
    %cst_28 = arith.constant dense<0.000000e+00> : vector<128x128xf32>
    %76 = tpu.matmul %74, %75, %cst_28 {dimension_numbers = #tpu.dot_dimension_numbers<[1], [1], [0], [0], [0, 0, 1, 0], [], []>} : vector<128x128xbf16>, vector<128x128xbf16>, vector<128x128xf32> -> vector<128x128xf32>
    %c0_29 = arith.constant 0 : index
    %c0_30 = arith.constant 0 : index
    %77 = vector.load %arg5[%c0_29, %c0_30] : memref<128x128xf32, #tpu.memory_space<vmem>>, vector<128x128xf32>
    %78 = arith.addf %76, %77 : vector<128x128xf32>
    %cst_31 = arith.constant dense<0xFF800000> : vector<128xf32>
    %79 = vector.multi_reduction <maximumf>, %78, %cst_31 [1] : vector<128x128xf32> to vector<128xf32>
    %80 = vector.shape_cast %79 : vector<128xf32> to vector<128x1xf32>
    %81 = vector.broadcast %80 : vector<128x1xf32> to vector<128x128xf32>
    %82 = arith.subf %78, %81 : vector<128x128xf32>
    %83 = math.exp %82 : vector<128x128xf32>
    %cst_32 = arith.constant dense<0.000000e+00> : vector<128xf32>
    %84 = vector.multi_reduction <add>, %83, %cst_32 [1] : vector<128x128xf32> to vector<128xf32>
    %85 = vector.shape_cast %84 : vector<128xf32> to vector<128x1xf32>
    %86 = tpu.reciprocal %85 {approx = true} : vector<128x1xf32> -> vector<128x1xf32>
    %87 = vector.broadcast %86 : vector<128x1xf32> to vector<128x128xf32>
    %88 = arith.mulf %83, %87 : vector<128x128xf32>
    %89 = arith.truncf %88 : vector<128x128xf32> to vector<128x128xbf16>
    %90 = arith.truncf %73 : vector<128x128xf32> to vector<128x128xbf16>
    %cst_33 = arith.constant dense<0.000000e+00> : vector<128x128xf32>
    %91 = tpu.matmul %89, %90, %cst_33 {dimension_numbers = #tpu.dot_dimension_numbers<[1], [0], [0], [1], [0, 0, 1, 1], [], []>} : vector<128x128xbf16>, vector<128x128xbf16>, vector<128x128xf32> -> vector<128x128xf32>
    %92 = arith.truncf %91 : vector<128x128xf32> to vector<128x128xbf16>
    %93 = vector.extract_strided_slice %54 {offsets = [0, 384], sizes = [128, 128], strides = [1, 1]} : vector<128x512xbf16> to vector<128x128xbf16>
    %cst_34 = arith.constant dense<0.000000e+00> : vector<128x128xf32>
    %94 = tpu.matmul %92, %93, %cst_34 {dimension_numbers = #tpu.dot_dimension_numbers<[1], [0], [0], [1], [0, 0, 1, 1], [], []>} : vector<128x128xbf16>, vector<128x128xbf16>, vector<128x128xf32> -> vector<128x128xf32>
    %95 = vector.extract_strided_slice %55 {offsets = [3, 0], sizes = [1, 128], strides = [1, 1]} : vector<4x128xf32> to vector<1x128xf32>
    %96 = vector.broadcast %95 : vector<1x128xf32> to vector<128x128xf32>
    %97 = arith.addf %94, %96 : vector<128x128xf32>
    %98 = vector.shape_cast %97 : vector<128x128xf32> to vector<8x16x128xf32>
    %c0_35 = arith.constant 0 : index
    %c0_36 = arith.constant 0 : index
    %c0_37 = arith.constant 0 : index
    %99 = vector.load %arg10[%c0_35, %c0_36, %c0_37] : memref<8x16x128xf32, #tpu.memory_space<vmem>>, vector<8x16x128xf32>
    tpu.vector_store %arg10[%c0_35, %c0_36, %c0_37], %98 {strides = array<i32>} : memref<8x16x128xf32, #tpu.memory_space<vmem>>, vector<8x16x128xf32>,
    return
  }
  func.func @transform_0(%arg0: i32) -> (i32, i32, i32) {
    %c0_i32 = arith.constant 0 : i32
    %c0_i32_0 = arith.constant 0 : i32
    %c0_i32_1 = arith.constant 0 : i32
    return %arg0, %c0_i32, %c0_i32_0 : i32, i32, i32
  }
  func.func @transform_1(%arg0: i32) -> (i32, i32, i32) {
    %c0_i32 = arith.constant 0 : i32
    %c0_i32_0 = arith.constant 0 : i32
    %c0_i32_1 = arith.constant 0 : i32
    return %arg0, %c0_i32, %c0_i32_0 : i32, i32, i32
  }
  func.func @transform_2(%arg0: i32) -> (i32, i32, i32) {
    %c0_i32 = arith.constant 0 : i32
    %c0_i32_0 = arith.constant 0 : i32
    %c0_i32_1 = arith.constant 0 : i32
    return %arg0, %c0_i32, %c0_i32_0 : i32, i32, i32
  }
  func.func @transform_3(%arg0: i32) -> (i32, i32, i32) {
    %c0_i32 = arith.constant 0 : i32
    %c0_i32_0 = arith.constant 0 : i32
    %c0_i32_1 = arith.constant 0 : i32
    return %arg0, %c0_i32, %c0_i32_0 : i32, i32, i32
  }
  func.func @transform_4(%arg0: i32) -> (i32, i32) {
    %c0_i32 = arith.constant 0 : i32
    %c0_i32_0 = arith.constant 0 : i32
    %c0_i32_1 = arith.constant 0 : i32
    return %c0_i32, %c0_i32_0 : i32, i32
  }
  func.func @transform_5(%arg0: i32) -> (i32, i32) {
    %c0_i32 = arith.constant 0 : i32
    %c0_i32_0 = arith.constant 0 : i32
    %c0_i32_1 = arith.constant 0 : i32
    return %c0_i32, %c0_i32_0 : i32, i32
  }
  func.func @transform_6(%arg0: i32) -> (i32, i32) {
    %c0_i32 = arith.constant 0 : i32
    %c0_i32_0 = arith.constant 0 : i32
    %c0_i32_1 = arith.constant 0 : i32
    return %c0_i32, %c0_i32_0 : i32, i32
  }
  func.func @transform_7(%arg0: i32) -> (i32, i32) {
    %c0_i32 = arith.constant 0 : i32
    %c0_i32_0 = arith.constant 0 : i32
    %c0_i32_1 = arith.constant 0 : i32
    return %c0_i32, %c0_i32_0 : i32, i32
  }
  func.func @transform_8(%arg0: i32) -> (i32, i32) {
    %c0_i32 = arith.constant 0 : i32
    %c0_i32_0 = arith.constant 0 : i32
    %c0_i32_1 = arith.constant 0 : i32
    return %c0_i32, %c0_i32_0 : i32, i32
  }
  func.func @transform_9(%arg0: i32) -> (i32, i32, i32) {
    %c0_i32 = arith.constant 0 : i32
    %c0_i32_0 = arith.constant 0 : i32
    %c0_i32_1 = arith.constant 0 : i32
    return %arg0, %c0_i32, %c0_i32_0 : i32, i32, i32
  }
}

</mosaic_0001>

<bundles_post_ra>
// kernel: tpu_custom_call.1
= control target key start
LH: loop header
LB: loop body
LE: loop exit
PB: predicated region body
PF: predicated region fallthrough
CT: control target
= control target key end

     0   :  { %s4898_s0 = inlined_call_operand.hbm [shape: f32[16,16,128], index: 0, kind: input, shape index: {}]   ;;  %s4899_s1 = inlined_call_operand.hbm [shape: f32[16,16,128], index: 1, kind: input, shape index: {}]   ;;  %s4900_s2 = inlined_call_operand.hbm [shape: f32[16,16,128], index: 2, kind: input, shape index: {}]   ;;  %s4901_s3 = inlined_call_operand.hbm [shape: f32[16,16,64], index: 3, kind: input, shape index: {}]   ;;  %s4902_s4 = inlined_call_operand.hbm [shape: f32[128,128], index: 4, kind: input, shape index: {}]   ;;  %s4903_s5 = inlined_call_operand.hbm [shape: bf16[64,256], index: 5, kind: input, shape index: {}]   ;;  %s4904_s6 = inlined_call_operand.vmem [shape: f32[4,128], index: 6, kind: input, shape index: {}]   ;;  %s4905_s7 = inlined_call_operand.hbm [shape: bf16[128,512], index: 7, kind: input, shape index: {}]   ;;  %s4906_s8 = inlined_call_operand.vmem [shape: f32[4,128], index: 8, kind: input, shape index: {}]   ;;  %s4907_s9 = inlined_call_operand.hbm [shape: f32[16,16,128], index: 9, kind: output, shape index: {}]  }
   0x1   :  { %4928 = sst [smem:[#allocation26_spill]] %s4899_s1 }
   0x2   :  { %4929 = sst [smem:[#allocation27_spill]] %s4902_s4 }
   0x3   :  { %4930 = sst [smem:[#allocation28_spill]] %s4903_s5 }
   0x4   :  { %4931 = sst [smem:[#allocation29_spill]] %s4906_s8 }
   0x5   :  { %4932 = sst [smem:[#allocation30_spill]] %s4907_s9 }
   0x6   :  { %14 = vsyncpa [#allocation3], 0 }
   0x7   :  { %16 = vsyncpa [#allocation3 + $0x1], 0 }
   0x8   :  { %17 = vsyncpa [#allocation6], 0 }
   0x9   :  { %19 = vsyncpa [#allocation6 + $0x1], 0 }
   0xa   :  { %20 = vsyncpa [#allocation9], 0 }
   0xb   :  { %22 = vsyncpa [#allocation9 + $0x1], 0 }
   0xc   :  { %23 = vsyncpa [#allocation12], 0 }
   0xd   :  { %24 = vsyncpa [#allocation4], 0 }
   0xe   :  { %26 = vsyncpa [#allocation4 + $0x1], 0  ;;  %s3704_s30 = smov 0   ;;  %s3706_s10 = smov 0  }
   0xf   :  { %s3708_s11 = smov 0   ;;  %s3710_s12 = smov 0  }
  0x10 LB: > { %4933 = sst [smem:[#allocation21_spill]] %s3625_s30  ;;  %s3725_s13 = sadd.s32 4294967295, %s3637_s12   ;;  %s3637_s12 = sphi %s3710_s12, %s4972_s12   ;;  %s3633_s11 = sphi %s3708_s11, %s4976_s11   ;;  %s3629_s10 = sphi %s3706_s10, %s4975_s10   ;;  %s3625_s30 = sphi %s3704_s30, %s4974_s30  }
  0x11   : > { %s2553_s14 = sadd.s32 4294967294, %s3637_s12   ;;  %s3729_s15 = sadd.s32 1, %s3637_s12  }
  0x12   : > { %4934 = sst [smem:[#allocation22_spill]] %s3729_s15  ;;  %s39_s16 = sadd.s32 1, %s3633_s11 }
  0x13   : > { %s36_s17 = ssub.s32 %s3637_s12, %s3729_s15  ;;  %p46_p0 = scmp.ne.s32.totalorder %s3633_s11, %s3629_s10 }
  0x14   : > { %p37_p1 = scmp.eq.s32.totalorder %s36_s17, 0  ;;  %p47_p2 = scmp.eq.s32.totalorder %s3637_s12, 0 }
  0x15   : > { %p52_p3 = scmp.ne.s32.totalorder %s3629_s10, %s3625_s30  ;;  %p4911_p4 = scmp.eq.s32.totalorder %s3725_s13, 0 }
  0x16   : > { %s3741_s18 = scalar_select %p37_p1, %s3633_s11, %s39_s16  }
  0x17   : > { %p3743_p5 = por %p47_p2, %p46_p0  ;;  %p3749_p6 = por %p4911_p4, %p52_p3 }
  0x18   : > { %4935 = sst [smem:[#allocation23_spill]] %s3741_s18  ;;  %p259_p7 = scmp.eq.s32.totalorder %s3725_s13, 1 }
  0x19   : > { %s4936_s19 = scalar_select %p3743_p5, 1, 0 }
  0x1a   : > { %s4937_s20 = scalar_select %p3749_p6, 1, 0 }
  0x1b   : > { %p265_p8 = scmp.eq.s32.totalorder %s2553_s14, 1  ;;  %p2554_p9 = scmp.ge.s32.totalorder %s3637_s12, 1 }
  0x1c   : > { %p272_p10 = scmp.lt.s32.totalorder %s3637_s12, 3  ;;  %p3756_p11 = por %p259_p7, %p46_p0 }
  0x1d   : > { %p3760_p12 = por %p265_p8, %p52_p3  ;;  %s3639_s24 = smov [#allocation10]  }
  0x1e   : > { %s4938_s21 = scalar_select %p3756_p11, 1, 0 }
  0x1f   : > { %s4940_s22 = scalar_select %p3760_p12, 1, 0 }
  0x20   : > { %4939 = sst [smem:[#allocation24_spill]] %s4938_s21  ;;  %p3764_p13 = pnand %p2554_p9, %p272_p10 }
  0x21   : > { %4941 = sst [smem:[#allocation25_spill]] %s4940_s22  ;;  %s284_s25 = sshll.u32 %s3639_s24, 4  ;;  %s285_s25 = int_to_ptr.vmem [resolvable:$true] %s284_s25 }
  0x22   : > { %s4942_s23 = scalar_select %p3764_p13, 1, 0 }
  0x23   : > { %p3006_p1 = pneg %p3764_p13  ;;  %s3640_s27 = smov [#allocation11]  }
  0x24   : > { %s297_s28 = sshll.u32 %s3640_s27, 4  ;;  %s4944_s4 = sld [smem:[#allocation27_spill]]  ;;  %s298_s28 = int_to_ptr.vmem [resolvable:$true] %s297_s28 }
  0x25   : > { %p3772_p2 = pnand %p3006_p1, %p4911_p4 }
  0x27   : > { %s4943_s26 = scalar_select %p3772_p2, 1, 0 }
  0x28   : > { %p3786_p8 = pneg %p3772_p2 }
  0x2a   : > { %s3351_s16 = scalar_lea.hbm %s4944_s4, 2048 }
  0x2b   : > { %p3352_p7 = scmp.ne.s32.totalorder %s4944_s4, %s3351_s16  ;;  %p3358_p1 = scmp.lt.u32.totalorder %s3351_s16, %s4944_s4 }
  0x2c   : > { %s4945_s24 = scalar_select %p3786_p8, 1, 0 }
  0x2d   : > { %p3354_p9 = pnand %p3786_p8, %p3352_p7 }
  0x2f   : > { %p3355_p10 = pneg %p3354_p9 }
  0x31   : > { %p3360_p0 = pnand %p3358_p1, %p3355_p10 }
  0x33   : > { %3363 = shalt.err (!%p3360_p0)
}
  0x34   : > { %s3364_s27 = scalar_lea.vmem %s285_s25, 2048  ;;  %p3372_p11 = scmp.lt.s32.totalorder %s285_s25, %s285_s25 }
  0x35   : > { %p3365_p4 = scmp.ne.s32.totalorder %s285_s25, %s3364_s27  ;;  %p3373_p6 = scmp.lt.s32.totalorder %s3364_s27, %s3364_s27 }
  0x37   : > { %p3367_p3 = pnand %p3365_p4, %p3786_p8  ;;  %p3374_p13 = por %p3373_p6, %p3372_p11 }
  0x39   : > { %p3368_p12 = pneg %p3367_p3 }
  0x3b   : > { %p3375_p5 = pnand %p3374_p13, %p3368_p12 }
  0x3d   : > { %3378 = shalt.err (!%p3375_p5)
}
  0x3e   : > { %s4920_s18 = smov 128   ;;  %s3642_s29 = smov 8  }
  0x3f   : > { %3009 = dma.hbm_to_vmem [thread:$0]  (!%p3772_p2), %s4944_s4, 2048, %s285_s25, [#allocation9], %s4920_s18, %s4920_s18, %s3642_s29  }
  0x40   : > { %s4919_s14 = sand.u32 1, %s3633_s11   ;;  %s4946_s5 = sld [smem:[#allocation28_spill]] }
  0x46   : > { %s3379_s27 = scalar_lea.hbm %s4946_s5, 1024 }
  0x47   : > { %p3380_p4 = scmp.ne.s32.totalorder %s4946_s5, %s3379_s27  ;;  %p3386_p11 = scmp.lt.u32.totalorder %s3379_s27, %s4946_s5 }
  0x49   : > { %p3382_p5 = pnand %p3380_p4, %p3786_p8 }
  0x4b   : > { %p3383_p6 = pneg %p3382_p5 }
  0x4d   : > { %p3388_p12 = pnand %p3386_p11, %p3383_p6 }
  0x4f   : > { %3391 = shalt.err (!%p3388_p12)
}
  0x50   : > { %s3392_s25 = scalar_lea.vmem %s298_s28, 1024  ;;  %p3400_p7 = scmp.lt.s32.totalorder %s298_s28, %s298_s28 }
  0x51   : > { %p3393_p13 = scmp.ne.s32.totalorder %s298_s28, %s3392_s25  ;;  %p3401_p9 = scmp.lt.s32.totalorder %s3392_s25, %s3392_s25 }
  0x53   : > { %p3395_p0 = pnand %p3393_p13, %p3786_p8  ;;  %p3402_p10 = por %p3401_p9, %p3400_p7 }
  0x55   : > { %p3396_p3 = pneg %p3395_p0 }
  0x57   : > { %p3403_p1 = pnand %p3402_p10, %p3396_p3 }
  0x59   : > { %3406 = shalt.err (!%p3403_p1)
}
  0x5a   : > { %3012 = dma.hbm_to_vmem [thread:$0]  (!%p3772_p2), %s4946_s5, 1024, %s298_s28, [#allocation12], %s4920_s18, %s4920_s18, %s3642_s29  }
  0x5b   : > { %s3829_s30 = sshll.u32 %s4919_s14, 7  ;;  %s3832_s21 = sshll.u32 %s3637_s12, 11 }
  0x5c   : > { %p4947_p4 = scmp.ne.s32.totalorder %s4936_s19, 0  ;;  %p4948_p5 = scmp.lt.s32.totalorder %s3637_s12, 2 }
  0x5d   : > { %s4922_s22 = sand.u32 1, %s3637_s12   ;;  %s4950_s1 = sld [smem:[#allocation26_spill]] }
  0x5e   : > { %p3838_p6 = pnand %p4948_p5, %p4947_p4  ;;  %s356_s28 = scalar_lea.vmem [#allocation5], %s3829_s30 }
  0x5f   : > { %s364_s25 = sshll.u32 %s356_s28, 4  ;;  %s3854_s19 = scalar_lea.sflag [#allocation6], %s4922_s22  ;;  %s3850_s25 = int_to_ptr.vmem [resolvable:$true] %s364_s25 }
  0x60   : > { %s4949_s15 = scalar_select %p3838_p6, 1, 0 }
  0x61   : > { %p3860_p12 = pneg %p3838_p6 }
  0x63   : > { %s3847_s27 = scalar_lea.hbm %s4950_s1, %s3832_s21  ;;  %s3412_s28 = scalar_lea.hbm %s4950_s1, 4096 }
  0x64   : > { %s3407_s8 = scalar_lea.hbm %s3847_s27, 2048  ;;  %p3413_p3 = scmp.lt.u32.totalorder %s3847_s27, %s4950_s1 }
  0x65   : > { %p3408_p11 = scmp.ne.s32.totalorder %s3847_s27, %s3407_s8  ;;  %p3414_p7 = scmp.lt.u32.totalorder %s3412_s28, %s3407_s8 }
  0x66   : > { %p3416_p10 = scmp.lt.u32.totalorder %s3407_s8, %s3847_s27 }
  0x67   : > { %p3410_p13 = pnand %p3860_p12, %p3408_p11  ;;  %p3415_p9 = por %p3414_p7, %p3413_p3 }
  0x69   : > { %p3411_p0 = pneg %p3410_p13  ;;  %p3417_p1 = por %p3416_p10, %p3415_p9 }
  0x6b   : > { %p3418_p4 = pnand %p3417_p1, %p3411_p0 }
  0x6d   : > { %3421 = shalt.err (!%p3418_p4)
}
  0x6e   : > { %s3422_s22 = scalar_lea.vmem %s3850_s25, 2048  ;;  %s3643_s16 = smov [#allocation5]  }
  0x6f   : > { %p3423_p5 = scmp.ne.s32.totalorder %s3850_s25, %s3422_s22  ;;  %s3427_s17 = sshll.u32 %s3643_s16, 4  ;;  %s3428_s17 = int_to_ptr.vmem [resolvable:$false] %s3427_s17 }
  0x70   : > { %s3429_s18 = scalar_lea.vmem %s3428_s17, 4096  ;;  %p3430_p2 = scmp.lt.s32.totalorder %s3850_s25, %s3428_s17 }
  0x71   : > { %p3425_p11 = pnand %p3423_p5, %p3860_p12  ;;  %p3431_p8 = scmp.lt.s32.totalorder %s3429_s18, %s3422_s22 }
  0x73   : > { %p3426_p13 = pneg %p3425_p11  ;;  %p3432_p3 = por %p3431_p8, %p3430_p2 }
  0x75   : > { %p3433_p7 = pnand %p3432_p3, %p3426_p13 }
  0x77   : > { %3436 = shalt.err (!%p3433_p7)
}
  0x78   : > { %s4952_s14 = smov 128   ;;  %s3644_s8 = smov [#allocation13]  }
  0x79   : > { %3022 = dma.hbm_to_vmem [thread:$0]  (!%p3838_p6), %s3847_s27, 2048, %s3850_s25, %s3854_s19, %s4952_s14, %s4952_s14, %s3642_s29  }
  0x7a   : > { %s313_s28 = sshll.u32 %s3644_s8, 4  ;;  %s3437_s22 = scalar_lea.hbm %s4905_s7, 4096  ;;  %s314_s28 = int_to_ptr.vmem [resolvable:$true] %s313_s28 }
  0x7b   : > { %p3438_p2 = scmp.ne.s32.totalorder %s4905_s7, %s3437_s22  ;;  %p4953_p8 = scmp.ne.s32.totalorder %s4945_s24, 0 }
  0x7c   : > { %p3444_p10 = scmp.lt.u32.totalorder %s3437_s22, %s4905_s7 }
  0x7d   : > { %p3440_p0 = pnand %p3438_p2, %p4953_p8 }
  0x7f   : > { %p3441_p9 = pneg %p3440_p0 }
  0x81   : > { %p3446_p1 = pnand %p3444_p10, %p3441_p9 }
  0x83   : > { %3449 = shalt.err (!%p3446_p1)
}
  0x84   : > { %s3450_s27 = scalar_lea.vmem %s314_s28, 4096  ;;  %p3458_p13 = scmp.lt.s32.totalorder %s314_s28, %s314_s28 }
  0x85   : > { %p3451_p4 = scmp.ne.s32.totalorder %s314_s28, %s3450_s27  ;;  %p3459_p3 = scmp.lt.s32.totalorder %s3450_s27, %s3450_s27 }
  0x87   : > { %p3453_p5 = pnand %p3451_p4, %p4953_p8  ;;  %p3460_p7 = por %p3459_p3, %p3458_p13 }
  0x89   : > { %p3454_p11 = pneg %p3453_p5 }
  0x8b   : > { %p3461_p6 = pnand %p3460_p7, %p3454_p11 }
  0x8d   : > { %3464 = shalt.err (!%p3461_p6)
}
  0x8e   : > { %s3645_s1 = smov 256   ;;  %s3646_s4 = smov 16  }
  0x8f   : > { %p4954_p2 = scmp.ne.s32.totalorder %s4943_s26, 0  ;;  %s3909_s16 = scalar_lea.hbm %s4898_s0, %s3832_s21 }
  0x90   : > { %s334_s22 = scalar_lea.vmem [#allocation2], %s3829_s30  ;;  %s4955_s18 = sand.u32 1, %s3633_s11  }
  0x91   : > { %3015 = dma.hbm_to_vmem [thread:$0]  (!%p4954_p2), %s4905_s7, 4096, %s314_s28, [#allocation12], %s3645_s1, %s3645_s1, %s3646_s4  }
  0x92   : > { %s342_s17 = sshll.u32 %s334_s22, 4  ;;  %s3916_s27 = scalar_lea.sflag [#allocation3], %s4955_s18  ;;  %s3912_s17 = int_to_ptr.vmem [resolvable:$true] %s342_s17 }
  0x93   : > { %s3465_s26 = scalar_lea.hbm %s3909_s16, 2048  ;;  %s3470_s4 = scalar_lea.hbm %s4898_s0, 4096 }
  0x94   : > { %p3466_p6 = scmp.ne.s32.totalorder %s3909_s16, %s3465_s26  ;;  %p3471_p9 = scmp.lt.u32.totalorder %s3909_s16, %s4898_s0 }
  0x95   : > { %p3472_p10 = scmp.lt.u32.totalorder %s3470_s4, %s3465_s26  ;;  %p3474_p4 = scmp.lt.u32.totalorder %s3465_s26, %s3909_s16 }
  0x96   : > { %p3468_p8 = pnand %p3466_p6, %p3860_p12 }
  0x97   : > { %p3473_p1 = por %p3472_p10, %p3471_p9 }
  0x98   : > { %p3469_p0 = pneg %p3468_p8 }
  0x99   : > { %p3475_p5 = por %p3474_p4, %p3473_p1 }
  0x9b   : > { %p3476_p11 = pnand %p3475_p5, %p3469_p0 }
  0x9d   : > { %3479 = shalt.err (!%p3476_p11)
}
  0x9e   : > { %s3480_s24 = scalar_lea.vmem %s3912_s17, 2048  ;;  %s3647_s8 = smov [#allocation2]  }
  0x9f   : > { %p3481_p13 = scmp.ne.s32.totalorder %s3912_s17, %s3480_s24  ;;  %s3485_s22 = sshll.u32 %s3647_s8, 4  ;;  %s3486_s22 = int_to_ptr.vmem [resolvable:$false] %s3485_s22 }
  0xa0   : > { %s3487_s18 = scalar_lea.vmem %s3486_s22, 4096  ;;  %p3488_p2 = scmp.lt.s32.totalorder %s3912_s17, %s3486_s22 }
  0xa1   : > { %p3483_p3 = pnand %p3481_p13, %p3860_p12  ;;  %p3489_p6 = scmp.lt.s32.totalorder %s3487_s18, %s3480_s24 }
  0xa3   : > { %p3484_p7 = pneg %p3483_p3  ;;  %p3490_p8 = por %p3489_p6, %p3488_p2 }
  0xa5   : > { %p3491_p9 = pnand %p3490_p8, %p3484_p7 }
  0xa7   : > { %3494 = shalt.err (!%p3491_p9)
}
  0xa8   : > { %p4956_p0 = scmp.ne.s32.totalorder %s4949_s15, 0  ;;  %s3947_s1 = scalar_lea.hbm %s4900_s2, %s3832_s21 }
  0xa9   : > { %s378_s4 = scalar_lea.vmem [#allocation7], %s3829_s30  ;;  %s3495_s25 = scalar_lea.hbm %s3947_s1, 2048 }
  0xaa   : > { %3019 = dma.hbm_to_vmem [thread:$0]  (!%p4956_p0), %s3909_s16, 2048, %s3912_s17, %s3916_s27, %s4952_s14, %s4952_s14, %s3642_s29  }
  0xab   : > { %s386_s5 = sshll.u32 %s378_s4, 4  ;;  %p3496_p10 = scmp.ne.s32.totalorder %s3947_s1, %s3495_s25  ;;  %s3950_s5 = int_to_ptr.vmem [resolvable:$true] %s386_s5 }
  0xac   : > { %s3500_s17 = scalar_lea.hbm %s4900_s2, 4096  ;;  %p3501_p5 = scmp.lt.u32.totalorder %s3947_s1, %s4900_s2 }
  0xad   : > { %p3498_p1 = pnand %p3496_p10, %p3860_p12  ;;  %p3502_p11 = scmp.lt.u32.totalorder %s3500_s17, %s3495_s25 }
  0xae   : > { %p3504_p3 = scmp.lt.u32.totalorder %s3495_s25, %s3947_s1 }
  0xaf   : > { %p3499_p4 = pneg %p3498_p1  ;;  %p3503_p13 = por %p3502_p11, %p3501_p5 }
  0xb1   : > { %p3505_p7 = por %p3504_p3, %p3503_p13 }
  0xb3   : > { %p3506_p2 = pnand %p3505_p7, %p3499_p4 }
  0xb5   : > { %3509 = shalt.err (!%p3506_p2)
}
  0xb6   : > { %s3510_s22 = scalar_lea.vmem %s3950_s5, 2048  ;;  %s3648_s18 = smov [#allocation7]  }
  0xb7   : > { %p3511_p6 = scmp.ne.s32.totalorder %s3950_s5, %s3510_s22  ;;  %s3515_s26 = sshll.u32 %s3648_s18, 4  ;;  %s3516_s26 = int_to_ptr.vmem [resolvable:$false] %s3515_s26 }
  0xb8   : > { %s3517_s28 = scalar_lea.vmem %s3516_s26, 4096  ;;  %p3518_p10 = scmp.lt.s32.totalorder %s3950_s5, %s3516_s26 }
  0xb9   : > { %p3513_p8 = pnand %p3511_p6, %p3860_p12  ;;  %p3519_p1 = scmp.lt.s32.totalorder %s3517_s28, %s3510_s22 }
  0xbb   : > { %p3514_p9 = pneg %p3513_p8  ;;  %p3520_p5 = por %p3519_p1, %p3518_p10 }
  0xbd   : > { %p3521_p11 = pnand %p3520_p5, %p3514_p9 }
  0xbf   : > { %3524 = shalt.err (!%p3521_p11)
}
  0xc0   : > { %3025 = dma.hbm_to_vmem [thread:$0]  (!%p4956_p0), %s3947_s1, 2048, %s3950_s5, %s3854_s19, %s4952_s14, %s4952_s14, %s3642_s29  }
  0xc1   : > { %s3981_s24 = scalar_lea.hbm %s4901_s3, %s3832_s21  ;;  %s400_s16 = scalar_lea.vmem [#allocation8], %s3829_s30 }
  0xc2   : > { %s408_s17 = sshll.u32 %s400_s16, 4  ;;  %s4957_s27 = sand.u32 1, %s3637_s12   ;;  %s3984_s17 = int_to_ptr.vmem [resolvable:$true] %s408_s17 }
  0xc3   : > { %s3988_s8 = scalar_lea.sflag [#allocation9], %s4957_s27  ;;  %s3525_s22 = scalar_lea.hbm %s3981_s24, 2048 }
  0xc4   : > { %p3526_p4 = scmp.ne.s32.totalorder %s3981_s24, %s3525_s22  ;;  %s3530_s21 = scalar_lea.hbm %s4901_s3, 4096 }
  0xc5   : > { %p3531_p7 = scmp.lt.u32.totalorder %s3981_s24, %s4901_s3  ;;  %p3532_p2 = scmp.lt.u32.totalorder %s3530_s21, %s3525_s22 }
  0xc6   : > { %p3528_p13 = pnand %p3526_p4, %p3860_p12  ;;  %p3534_p8 = scmp.lt.u32.totalorder %s3525_s22, %s3981_s24 }
  0xc7   : > { %p3533_p6 = por %p3532_p2, %p3531_p7 }
  0xc8   : > { %p3529_p3 = pneg %p3528_p13 }
  0xc9   : > { %p3535_p9 = por %p3534_p8, %p3533_p6 }
  0xcb   : > { %p3536_p10 = pnand %p3535_p9, %p3529_p3 }
  0xcd   : > { %3539 = shalt.err (!%p3536_p10)
}
  0xce   : > { %s3540_s30 = scalar_lea.vmem %s3984_s17, 2048  ;;  %s3649_s26 = smov [#allocation8]  }
  0xcf   : > { %p3541_p1 = scmp.ne.s32.totalorder %s3984_s17, %s3540_s30  ;;  %s3545_s28 = sshll.u32 %s3649_s26, 4  ;;  %s3546_s28 = int_to_ptr.vmem [resolvable:$false] %s3545_s28 }
  0xd0   : > { %s3547_s4 = scalar_lea.vmem %s3546_s28, 4096  ;;  %p3548_p4 = scmp.lt.s32.totalorder %s3984_s17, %s3546_s28 }
  0xd1   : > { %p3543_p5 = pnand %p3541_p1, %p3860_p12  ;;  %p3549_p13 = scmp.lt.s32.totalorder %s3547_s4, %s3540_s30 }
  0xd3   : > { %p3544_p11 = pneg %p3543_p5  ;;  %p3550_p7 = por %p3549_p13, %p3548_p4 }
  0xd5   : > { %p3551_p2 = pnand %p3550_p7, %p3544_p11 }
  0xd7   : > { %3554 = shalt.err (!%p3551_p2)
}
  0xd8   : > { %3028 = dma.hbm_to_vmem [thread:$0]  (!%p4956_p0), %s3981_s24, 2048, %s3984_s17, %s3988_s8, %s4952_s14, %s4952_s14, %s3642_s29  }
  0xd9   : > { %p4958_p12 = scmp.ne.s32.totalorder %s4942_s23, 0 }
  0xda   : > { %s4018_s9 = sand.u32 (!%p4958_p12), 1, %s3629_s10   ;;  %p4959_p3 = scmp.ne.s32.totalorder (!%p4958_p12), %s4937_s20, 0 }
  0xdb   : > { %420 = sbr.rel (%p4958_p12) target bundleno = 1785 (0x6f9), region = 56  ;;  %s4021_s25 = sshll.u32 (!%p4958_p12), %s4018_s9, 7 }
  0xdc   : > { %s423_s15 = scalar_lea.sflag (!%p4958_p12), [#allocation3], %s4018_s9  ;;  %s4025_s16 = scalar_lea.vmem (!%p4958_p12), [#allocation2], %s4021_s25 }
  0xe2   : > { %3600 = dma.done.wait (%p4959_p3), %s423_s15, 2048  }
  0xe3   : > { %3602 = vsyncadd (%p4959_p3), %s423_s15, 4294965248  ;;  %s431_s23 = sand.u32 1, %s3725_s13   ;;  %s4033_s14 = scalar_lea.vmem [#allocation5], %s4021_s25 }
  0xe4   : > { %s432_s29 = scalar_lea.sflag [#allocation6], %s431_s23 }
  0xe5   : > { %3604 = dma.done.wait (%p4959_p3), %s432_s29, 4096  }
  0xe6   : > { %3606 = vsyncadd (%p4959_p3), %s432_s29, 4294963200  ;;  %s4040_s24 = scalar_lea.vmem [#allocation7], %s4021_s25  ;;  %s450_s17 = scalar_lea.sflag [#allocation9], %s431_s23 }
  0xe7   : > { %s4043_s27 = scalar_lea.vmem [#allocation8], %s4021_s25 }
  0xe8   : > { %3608 = dma.done.wait (%p4959_p3), %s450_s17, 2048  }
  0xe9   : > { %3610 = vsyncadd (%p4959_p3), %s450_s17, 4294965248  ;;  %p4960_p0 = scmp.eq.s32.totalorder %s3725_s13, 0 }
  0xeb   : > { %3612 = dma.done.wait (%p4960_p0), [#allocation9], 2048   ;;  %p4961_p6 = pmov %p4960_p0 }
  0xec   : > { %p4962_p8 = pmov %p4960_p0 }
  0xed   : > { %3614 = vsyncadd (%p4961_p6), [#allocation9], 4294965248 }
  0xee   : > { %3616 = dma.done.wait (%p4962_p8), [#allocation12], 5120   ;;  %p4963_p9 = pmov %p4960_p0 }
  0xef   : > { %v586_v0 = vlaneseq  ;;  %v3650_v1 = vmov 0   ;;  %v3083_v6 = vld [vmem:[#allocation11 + $0x4] ss:$8 sps:$4 sm:$0xff]   ;;  %v3085_v7 = vld [vmem:[#allocation11] ss:$8 sps:$4 sm:$0xff]   ;;  %v540_v8 = vld [vmem:[%s4033_s14 + $0x18] sm:$0xff] }
  0xf0   : > { %3618 = vsyncadd (%p4963_p9), [#allocation12], 4294962176  ;;  %1163 = vmatprep.mubr.bf16.mxu0 %v3650_v1  ;;  %v4067_v9 = vld [vmem:[%s4904_s6] sm:$0xf]  ;;  %1131 = vmatprep.subr.bf16.mxu0 %v3083_v6  ;;  %v3086_v14 = vld [vmem:[#allocation11 + $0x14] ss:$8 sps:$4 sm:$0xff]  }
  0xf1   : > { %v4058_v2 = vshrl.u32 %v586_v0, 7  ;;  %v537_v11 = vld [vmem:[%s4033_s14] sm:$0xff]  ;;  %1132 = vmatpush1.bf16.msra.mxu0 %v3085_v7  ;;  %v3088_v15 = vld [vmem:[#allocation11 + $0x10] ss:$8 sps:$4 sm:$0xff]   ;;  %vm658_vm0 = vcmask 523264   ;;  %v538_v20 = vld [vmem:[%s4033_s14 + $0x8] sm:$0xff] }
  0xf2   : > { %v569_v16 = vld [vmem:[%s4043_s27] sm:$0xff]  ;;  %1133 = vmatprep.subr.bf16.mxu0 %v3086_v14  ;;  %v4094_v23 = vld [vmem:[%s4043_s27 + $0x8] sm:$0xff]  ;;  %v539_v28 = vld [vmem:[%s4033_s14 + $0x10] sm:$0xff]  ;;  %s4964_s1 = sld [smem:[#allocation29_spill]]  ;;  %s4829_s21 = scalar_lea.vmem [#allocation14], %s4021_s25 }
  0xf3   : > { %v588_v3 = vsub.s32 0, %v4058_v2  ;;  %v640_v4 = vsub.s32 2, %v4058_v2  ;;  %v873_v5 = vsub.s32 3, %v4058_v2  ;;  %v3089_v22 = vld [vmem:[#allocation11 + $0x24] ss:$8 sps:$4 sm:$0xff]   ;;  %v572_v29 = vld [vmem:[%s4043_s27 + $0x18] sm:$0xff]  ;;  %v1051_v38 = vpack.c.bf16 %v4094_v23, %v569_v16 }
  0xf4   : > { %v3091_v26 = vld [vmem:[#allocation11 + $0x20] ss:$8 sps:$4 sm:$0xff]   ;;  %v3092_v30 = vld [vmem:[#allocation11 + $0x34] ss:$8 sps:$4 sm:$0xff]   ;;  %v3094_v35 = vld [vmem:[#allocation11 + $0x30] ss:$8 sps:$4 sm:$0xff]  }
  0xf5   : > { %v4072_v10 = vrot.slane %v4067_v9, %v588_v3  ;;  %v4078_v12 = vrot.slane %v4067_v9, %v640_v4  ;;  %v4083_v13 = vrot.slane %v4067_v9, %v873_v5  ;;  %1134 = vmatpush1.bf16.msra.mxu0 %v3088_v15  ;;  %v571_v31 = vld [vmem:[%s4043_s27 + $0x10] sm:$0xff]  ;;  %v542_v41 = vld [vmem:[%s4033_s14 + $0x28] sm:$0xff]  ;;  %v541_v42 = vld [vmem:[%s4033_s14 + $0x20] sm:$0xff]  ;;  %s2679_s5 = sshll.u32 %s3725_s13, 11  ;;  %s2386_s18 = sshll.u32 %s4829_s21, 4  ;;  %s4851_s18 = int_to_ptr.vmem [resolvable:$true] %s2386_s18 }
  0xf6   : > { %1135 = vmatprep.subr.bf16.mxu0 %v3089_v22  ;;  %v574_v43 = vld [vmem:[%s4043_s27 + $0x28] sm:$0xff]  ;;  %v573_v44 = vld [vmem:[%s4043_s27 + $0x20] sm:$0xff]  ;;  %v544_v49 = vld [vmem:[%s4033_s14 + $0x38] sm:$0xff]  ;;  %v1052_v57 = vpack.c.bf16 %v572_v29, %v571_v31  ;;  %s4965_s30 = sld [smem:[#allocation24_spill]]  ;;  %s4966_s4 = sld [smem:[#allocation30_spill]] }
  0xf7   : > { %v593_v17 = vmul.f32 %v4072_v10, %v540_v8  ;;  %v590_v18 = vmul.f32 %v4072_v10, %v537_v11  ;;  %v642_v19 = vmul.f32 %v4078_v12, %v569_v16  ;;  %v4091_v21 = vmul.f32 %v4083_v13, %v569_v16  ;;  %v543_v50 = vld [vmem:[%s4033_s14 + $0x30] sm:$0xff]  ;;  %v4126_v51 = vld [vmem:[%s4043_s27 + $0x38] sm:$0xff]  ;;  %v4133_v54 = vld [vmem:[%s4043_s27 + $0x48] sm:$0xff]  ;;  %s2372_s13 = scalar_lea.sflag [#allocation4], %s4018_s9  ;;  %s3555_s15 = scalar_lea.vmem %s4851_s18, 2048 }
  0xf8   : > { %v591_v24 = vmul.f32 %v4072_v10, %v538_v20  ;;  %v643_v27 = vmul.f32 %v4078_v12, %v4094_v23  ;;  %v4104_v32 = vmul.f32 %v4083_v13, %v572_v29  ;;  %v592_v33 = vmul.f32 %v4072_v10, %v539_v28  ;;  %v575_v52 = vld [vmem:[%s4043_s27 + $0x30] sm:$0xff]  ;;  %v4136_v55 = vld [vmem:[%s4043_s27 + $0x40] sm:$0xff]  ;;  %v4147_v61 = vld [vmem:[%s4043_s27 + $0x58] sm:$0xff]  ;;  %p3556_p10 = scmp.ne.s32.totalorder %s4851_s18, %s3555_s15 }
  0xf9   : > { %612 = vadd.xlane.f32.xlu1 %v593_v17  ;;  %606 = vadd.xlane.f32.xlu0 %v590_v18  ;;  %v659_v25 = vsel %vm658_vm0, %v642_v19, 0.0  ;;  %v645_v36 = vmul.f32 %v4078_v12, %v572_v29  ;;  %v644_v37 = vmul.f32 %v4078_v12, %v571_v31  ;;  %v595_v45 = vmul.f32 %v4072_v10, %v542_v41  ;;  %v4150_v62 = vld [vmem:[%s4043_s27 + $0x50] sm:$0xff]  ;;  %v4160_v6 = vld [vmem:[%s4043_s27 + $0x68] sm:$0xff]  ;;  %v4163_v7 = vld [vmem:[%s4043_s27 + $0x60] sm:$0xff] }
  0xfa   : > { %1136 = vmatpush1.bf16.msra.mxu0 %v3091_v26  ;;  %v662_v34 = vsel %vm658_vm0, %v643_v27, 0.0  ;;  %v594_v46 = vmul.f32 %v4072_v10, %v541_v42  ;;  %v647_v47 = vmul.f32 %v4078_v12, %v574_v43  ;;  %v646_v48 = vmul.f32 %v4078_v12, %v573_v44  ;;  %v4180_v18 = vld [vmem:[%s4043_s27 + $0x78] sm:$0xff]  ;;  %v4183_v19 = vld [vmem:[%s4043_s27 + $0x70] sm:$0xff]  ;;  %v546_v26 = vld [vmem:[%s4033_s14 + $0x48] sm:$0xff] }
  0xfb   : > { %1137 = vmatprep.subr.bf16.mxu0 %v3092_v30  ;;  %v668_v39 = vsel %vm658_vm0, %v645_v36, 0.0  ;;  %v665_v40 = vsel %vm658_vm0, %v644_v37, 0.0  ;;  %v4130_v53 = vmul.f32 %v4083_v13, %v571_v31  ;;  %v4139_v56 = vmul.f32 %v4083_v13, %v574_v43  ;;  %v545_v27 = vld [vmem:[%s4033_s14 + $0x40] sm:$0xff]  ;;  %v548_v41 = vld [vmem:[%s4033_s14 + $0x58] sm:$0xff]  ;;  %v547_v42 = vld [vmem:[%s4033_s14 + $0x50] sm:$0xff] }
  0xfc   : > { %v674_v58 = vsel %vm658_vm0, %v647_v47, 0.0  ;;  %v671_v59 = vsel %vm658_vm0, %v646_v48, 0.0  ;;  %v4144_v60 = vmul.f32 %v4083_v13, %v573_v44  ;;  %v4154_v63 = vmul.f32 %v4083_v13, %v4126_v51  ;;  %s4849_s25 = scalar_lea.hbm %s4966_s4, %s2679_s5  ;;  %p4967_p1 = scmp.ne.s32.totalorder %s4965_s30, 0 }
  0xfd   : > { %660 = vadd.xlane.f32.xlu1 %v659_v25  ;;  %608 = vadd.xlane.f32.xlu0 %v591_v24  ;;  %v4157_v0 = vmul.f32 %v4083_v13, %v575_v52  ;;  %v4167_v8 = vmul.f32 %v4083_v13, %v4133_v54  ;;  %v4171_v11 = vmul.f32 %v4083_v13, %v4136_v55 }
  0xfe   : > { %1138 = vmatpush1.bf16.msra.mxu0 %v3094_v35  ;;  %v597_v14 = vmul.f32 %v4072_v10, %v544_v49  ;;  %v596_v15 = vmul.f32 %v4072_v10, %v543_v50  ;;  %v649_v16 = vmul.f32 %v4078_v12, %v4126_v51  ;;  %v648_v17 = vmul.f32 %v4078_v12, %v575_v52  ;;  %v550_v50 = vld [vmem:[%s4033_s14 + $0x68] sm:$0xff]  ;;  %p3557_p5 = pnand %p3556_p10, %p4967_p1 }
  0xff   : > { %v4187_v20 = vmul.f32 %v4083_v13, %v4147_v61  ;;  %v4191_v22 = vmul.f32 %v4083_v13, %v4150_v62  ;;  %v4196_v24 = vmul.f32 %v4083_v13, %v4160_v6  ;;  %v4200_v25 = vmul.f32 %v4083_v13, %v4163_v7 }
 0x100   : > { %v4206_v28 = vmul.f32 %v4083_v13, %v4180_v18  ;;  %v4210_v29 = vmul.f32 %v4083_v13, %v4183_v19  ;;  %v1053_v30 = vpack.c.bf16 %v574_v43, %v573_v44  ;;  %v680_v31 = vsel %vm658_vm0, %v649_v16, 0.0  ;;  %v552_v16 = vld [vmem:[%s4033_s14 + $0x78] sm:$0xff]  ;;  %p3558_p11 = pneg %p3557_p5 }
 0x101   : > { %663 = vadd.xlane.f32.xlu1 %v662_v34  ;;  %610 = vadd.xlane.f32.xlu0 %v592_v33  ;;  %v677_v33 = vsel %vm658_vm0, %v648_v17, 0.0  ;;  %v599_v34 = vmul.f32 %v4072_v10, %v546_v26  ;;  %v598_v35 = vmul.f32 %v4072_v10, %v545_v27  ;;  %v651_v36 = vmul.f32 %v4078_v12, %v4133_v54  ;;  %v551_v17 = vld [vmem:[%s4033_s14 + $0x70] sm:$0xff] }
 0x102   : > { %2624 = vmatmul.mubr.msk.bf16.vlgmr.msra.gmra.mrb[0].mxu0 %vm658_vm0, %v1051_v38  ;;  %v650_v37 = vmul.f32 %v4078_v12, %v4136_v55  ;;  %v1054_v38 = vpack.c.bf16 %v4126_v51, %v575_v52  ;;  %v601_v43 = vmul.f32 %v4072_v10, %v548_v41  ;;  %v600_v44 = vmul.f32 %v4072_v10, %v547_v42  ;;  %v549_v51 = vld [vmem:[%s4033_s14 + $0x60] sm:$0xff] }
 0x103   : > { %1173 = vmatprep.mubr.bf16.mxu0 %v3650_v1  ;;  %v1055_v47 = vpack.c.bf16 %v4133_v54, %v4136_v55  ;;  %v603_v52 = vmul.f32 %v4072_v10, %v550_v50  ;;  %v654_v54 = vmul.f32 %v4078_v12, %v4163_v7  ;;  %v3095_v55 = vld [vmem:[#allocation13] ss:$16 sps:$4 sm:$0xff]   ;;  %v605_v27 = vmul.f32 %v4072_v10, %v552_v16  ;;  %v522_v50 = vld [vmem:[%s4025_s16 + $0x8] sm:$0xff] }
 0x104   : > { %2776 = vmatprep.subr.bf16.mxu1 %v3095_v55  ;;  %v3098_v26 = vld [vmem:[#allocation13 + $0x20] ss:$16 sps:$4 sm:$0xff]   ;;  %v891_v42 = vsel %vm658_vm0, %v4091_v21, 0.0 }
 0x105   : > { %669 = vadd.xlane.f32.xlu1 %v668_v39  ;;  %666 = vadd.xlane.f32.xlu0 %v665_v40  ;;  %v686_v39 = vsel %vm658_vm0, %v651_v36, 0.0  ;;  %v683_v40 = vsel %vm658_vm0, %v650_v37, 0.0  ;;  %v4277_v37 = vld [vmem:[%s4040_s24] sm:$0xff] }
 0x106   : > { %2777 = vmatpush3.bf16.msra.mxu1 %v3095_v55  ;;  %v3108_v21 = vld [vmem:[#allocation13 + $0xc0] ss:$16 sps:$4 sm:$0xff]   ;;  %v903_v55 = vsel %vm658_vm0, %v4144_v60, 0.0 }
 0x107   : > { %2778 = vmatprep.subr.bf16.mxu1 %v3098_v26 }
 0x109   : > { %616 = vadd.xlane.f32.xlu1 %v595_v45  ;;  %614 = vadd.xlane.f32.xlu0 %v594_v46  ;;  %v653_v45 = vmul.f32 %v4078_v12, %v4147_v61  ;;  %v652_v46 = vmul.f32 %v4078_v12, %v4150_v62 }
 0x10a   : > { %2625 = vmatmul.mubr.msk.bf16.gmra.mrb[4].mxu0 %vm658_vm0, %v1052_v57  ;;  %v602_v57 = vmul.f32 %v4072_v10, %v549_v51  ;;  %2779 = vmatpush3.bf16.msra.mxu1 %v3098_v26  ;;  %v3112_v26 = vld [vmem:[#allocation13 + $0x24] ss:$16 sps:$4 sm:$0xff]  }
 0x10b   : > { %1183 = vmatprep.mubr.bf16.mxu0 %v3650_v1  ;;  %v692_v48 = vsel %vm658_vm0, %v653_v45, 0.0  ;;  %v689_v49 = vsel %vm658_vm0, %v652_v46, 0.0  ;;  %v4308_v45 = vld [vmem:[%s4040_s24 + $0x28] sm:$0xff]  ;;  %v4311_v46 = vld [vmem:[%s4040_s24 + $0x20] sm:$0xff] }
 0x10d   : > { %675 = vadd.xlane.f32.xlu1 %v674_v58  ;;  %672 = vadd.xlane.f32.xlu0 %v671_v59  ;;  %v655_v58 = vmul.f32 %v4078_v12, %v4160_v6  ;;  %v1056_v59 = vpack.c.bf16 %v4147_v61, %v4150_v62  ;;  %v657_v61 = vmul.f32 %v4078_v12, %v4180_v18 }
 0x10e   : > { %v656_v62 = vmul.f32 %v4078_v12, %v4183_v19  ;;  %v4274_v12 = vld [vmem:[%s4040_s24 + $0x8] sm:$0xff] }
 0x110   : > { %v701_v36 = vsel %vm658_vm0, %v656_v62, 0.0  ;;  %v912_v62 = vsel %vm658_vm0, %v4154_v63, 0.0 }
 0x111   : > { %620 = vadd.xlane.f32.xlu1 %v597_v14  ;;  %618 = vadd.xlane.f32.xlu0 %v596_v15  ;;  %v698_v14 = vsel %vm658_vm0, %v655_v58, 0.0  ;;  %v695_v15 = vsel %vm658_vm0, %v654_v54, 0.0  ;;  %v906_v54 = vsel %vm658_vm0, %v4139_v56, 0.0  ;;  %v525_v56 = vld [vmem:[%s4025_s16 + $0x20] sm:$0xff] }
 0x112   : > { %2626 = vmatmul.mubr.msk.bf16.gmra.mrb[8].mxu0 %vm658_vm0, %v1053_v30  ;;  %v604_v30 = vmul.f32 %v4072_v10, %v551_v17  ;;  %v526_v17 = vld [vmem:[%s4025_s16 + $0x28] sm:$0xff] }
 0x113   : > { %1193 = vmatprep.mubr.bf16.mxu0 %v3650_v1  ;;  %v1375_v60 = vpack.c.bf16 %v526_v17, %v525_v56  ;;  %v3130_v56 = vld [vmem:[#allocation13 + $0x88] ss:$16 sps:$4 sm:$0xff]   ;;  %v3133_v17 = vld [vmem:[#allocation13 + $0xe4] ss:$16 sps:$4 sm:$0xff]  }
 0x115   : > { %681 = vadd.xlane.f32.xlu1 %v680_v31  ;;  %678 = vadd.xlane.f32.xlu0 %v677_v33  ;;  %v821_v31 = vsub.s32 1, %v4058_v2  ;;  %v3100_v33 = vld [vmem:[#allocation13 + $0x40] ss:$16 sps:$4 sm:$0xff]  }
 0x116   : > { %2780 = vmatprep.subr.bf16.mxu1 %v3100_v33 }
 0x117   : > { %v4267_v10 = vrot.slane %v4067_v9, %v821_v31  ;;  %2781 = vmatpush3.bf16.msra.mxu1 %v3100_v33  ;;  %v909_v33 = vsel %vm658_vm0, %v4157_v0, 0.0 }
 0x119   : > { %624 = vadd.xlane.f32.xlu1 %v599_v34  ;;  %622 = vadd.xlane.f32.xlu0 %v598_v35  ;;  %v1057_v34 = vpack.c.bf16 %v4160_v6, %v4163_v7  ;;  %v704_v35 = vsel %vm658_vm0, %v657_v61, 0.0  ;;  %v824_v9 = vmul.f32 %v4267_v10, %v4274_v12  ;;  %v823_v6 = vmul.f32 %v4267_v10, %v4277_v37 }
 0x11a   : > { %2627 = vmatmul.mubr.msk.bf16.gmra.mrb[12].mxu0 %vm658_vm0, %v1054_v38  ;;  %v3102_v38 = vld [vmem:[#allocation13 + $0x60] ss:$16 sps:$4 sm:$0xff]   ;;  %v876_v7 = vmul.f32 %v4083_v13, %v4094_v23 }
 0x11b   : > { %1203 = vmatprep.mubr.bf16.mxu0 %v3650_v1  ;;  %2782 = vmatprep.subr.bf16.mxu1 %v3102_v38 }
 0x11c   : > { %2783 = vmatpush3.bf16.msra.mxu1 %v3102_v38  ;;  %v894_v41 = vsel %vm658_vm0, %v876_v7, 0.0  ;;  %v3114_v38 = vld [vmem:[#allocation13 + $0x8] ss:$16 sps:$4 sm:$0xff]   ;;  %v3117_v7 = vld [vmem:[#allocation13 + $0x64] ss:$16 sps:$4 sm:$0xff]  }
 0x11d   : > { %687 = vadd.xlane.f32.xlu1 %v686_v39  ;;  %684 = vadd.xlane.f32.xlu0 %v683_v40  ;;  %v3104_v39 = vld [vmem:[#allocation13 + $0x80] ss:$16 sps:$4 sm:$0xff]   ;;  %v1058_v40 = vpack.c.bf16 %v4180_v18, %v4183_v19  ;;  %v900_v18 = vsel %vm658_vm0, %v4104_v32, 0.0  ;;  %v897_v19 = vsel %vm658_vm0, %v4130_v53, 0.0  ;;  %v827_v32 = vmul.f32 %v4267_v10, %v4311_v46 }
 0x11e   : > { %2784 = vmatprep.subr.bf16.mxu1 %v3104_v39  ;;  %v521_v53 = vld [vmem:[%s4025_s16] sm:$0xff]  ;;  %2840 = vmatprep.subr.bf16.mxu0 %v3114_v38 }
 0x11f   : > { %v1373_v51 = vpack.c.bf16 %v522_v50, %v521_v53  ;;  %2841 = vmatpush3.bf16.msra.mxu0 %v3114_v38  ;;  %v535_v50 = vld [vmem:[%s4025_s16 + $0x70] sm:$0xff]  ;;  %v933_v38 = vsel %vm658_vm0, %v4210_v29, 0.0 }
 0x120   : > { %2785 = vmatpush3.bf16.msra.mxu1 %v3104_v39 }
 0x121   : > { %628 = vadd.xlane.f32.xlu1 %v601_v43  ;;  %626 = vadd.xlane.f32.xlu0 %v600_v44  ;;  %v4293_v43 = vld [vmem:[%s4040_s24 + $0x18] sm:$0xff]  ;;  %v4296_v44 = vld [vmem:[%s4040_s24 + $0x10] sm:$0xff] }
 0x122   : > { %2628 = vmatmul.mubr.msk.bf16.gmra.mrb[16].mxu0 %vm658_vm0, %v1055_v47  ;;  %v826_v13 = vmul.f32 %v4267_v10, %v4293_v43  ;;  %v825_v23 = vmul.f32 %v4267_v10, %v4296_v44  ;;  %v3110_v47 = vld [vmem:[#allocation13 + $0xe0] ss:$16 sps:$4 sm:$0xff]   ;;  %2792 = vmatprep.mubr.bf16.mxu1 %v1373_v51  ;;  %v536_v51 = vld [vmem:[%s4025_s16 + $0x78] sm:$0xff] }
 0x123   : > { %1213 = vmatprep.mubr.bf16.mxu0 %v3650_v1 }
 0x125   : > { %693 = vadd.xlane.f32.xlu1 %v692_v48  ;;  %690 = vadd.xlane.f32.xlu0 %v689_v49  ;;  %v3097_v48 = vld [vmem:[#allocation13 + $0x4] ss:$16 sps:$4 sm:$0xff]   ;;  %v828_v49 = vmul.f32 %v4267_v10, %v4308_v45 }
 0x129   : > { %632 = vadd.xlane.f32.xlu1 %v603_v52  ;;  %630 = vadd.xlane.f32.xlu0 %v602_v57  ;;  %v523_v52 = vld [vmem:[%s4025_s16 + $0x10] sm:$0xff]  ;;  %v524_v57 = vld [vmem:[%s4025_s16 + $0x18] sm:$0xff] }
 0x12a   : > { %2629 = vmatmul.mubr.msk.bf16.gmra.mrb[20].mxu0 %vm658_vm0, %v1056_v59  ;;  %v1374_v58 = vpack.c.bf16 %v524_v57, %v523_v52  ;;  %v4326_v59 = vld [vmem:[%s4040_s24 + $0x38] sm:$0xff]  ;;  %v1380_v57 = vpack.c.bf16 %v536_v51, %v535_v50 }
 0x12b   : > { %1223 = vmatprep.mubr.bf16.mxu0 %v3650_v1  ;;  %v3126_v52 = vld [vmem:[#allocation13 + $0x68] ss:$16 sps:$4 sm:$0xff]  }
 0x12d   : > { %699 = vadd.xlane.f32.xlu1 %v698_v14  ;;  %696 = vadd.xlane.f32.xlu0 %v695_v15  ;;  %v4329_v14 = vld [vmem:[%s4040_s24 + $0x30] sm:$0xff]  ;;  %v830_v15 = vmul.f32 %v4267_v10, %v4326_v59 }
 0x12e   : > { %v829_v16 = vmul.f32 %v4267_v10, %v4329_v14 }
 0x131   : > { %636 = vadd.xlane.f32.xlu1 %v605_v27  ;;  %634 = vadd.xlane.f32.xlu0 %v604_v30  ;;  %v527_v27 = vld [vmem:[%s4025_s16 + $0x30] sm:$0xff]  ;;  %v528_v30 = vld [vmem:[%s4025_s16 + $0x38] sm:$0xff] }
 0x132   : > { %2630 = vmatmul.mubr.msk.bf16.gmra.mrb[24].mxu0 %vm658_vm0, %v1057_v34  ;;  %v1376_v61 = vpack.c.bf16 %v528_v30, %v527_v27  ;;  %v4344_v34 = vld [vmem:[%s4040_s24 + $0x48] sm:$0xff]  ;;  %v927_v27 = vsel %vm658_vm0, %v4200_v25, 0.0  ;;  %v4394_v30 = vld [vmem:[%s4040_s24 + $0x78] sm:$0xff] }
 0x133   : > { %1233 = vmatprep.mubr.bf16.mxu0 %v3650_v1  ;;  %v3106_v1 = vld [vmem:[#allocation13 + $0xa0] ss:$16 sps:$4 sm:$0xff]   ;;  %v832_v63 = vmul.f32 %v4267_v10, %v4344_v34  ;;  %v3140_v25 = vld [vmem:[#allocation13 + $0xe8] ss:$16 sps:$4 sm:$0xff]  }
 0x134   : > { %2786 = vmatprep.subr.bf16.mxu1 %v3106_v1 }
 0x135   : > { %705 = vadd.xlane.f32.xlu1 %v704_v35  ;;  %702 = vadd.xlane.f32.xlu0 %v701_v36  ;;  %v4347_v35 = vld [vmem:[%s4040_s24 + $0x40] sm:$0xff] }
 0x136   : > { %2787 = vmatpush3.bf16.msra.mxu1 %v3106_v1  ;;  %v3113_v36 = vld [vmem:[#allocation13 + $0x44] ss:$16 sps:$4 sm:$0xff]   ;;  %v831_v0 = vmul.f32 %v4267_v10, %v4347_v35 }
 0x137   : > { %2788 = vmatprep.subr.bf16.mxu1 %v3108_v21 }
 0x139   : > { %841 = vadd.xlane.f32.xlu1 %v824_v9  ;;  %839 = vadd.xlane.f32.xlu0 %v823_v6  ;;  %v529_v9 = vld [vmem:[%s4025_s16 + $0x40] sm:$0xff]  ;;  %v530_v6 = vld [vmem:[%s4025_s16 + $0x48] sm:$0xff] }
 0x13a   : > { %2631 = vmatmul.mubr.msk.bf16.gmra.mrb[28].mxu0 %vm658_vm0, %v1058_v40  ;;  %2789 = vmatpush3.bf16.msra.mxu1 %v3108_v21  ;;  %v1377_v39 = vpack.c.bf16 %v530_v6, %v529_v9  ;;  %v531_v40 = vld [vmem:[%s4025_s16 + $0x50] sm:$0xff]  ;;  %v4362_v21 = vld [vmem:[%s4040_s24 + $0x58] sm:$0xff] }
 0x13b   : > { %2790 = vmatprep.subr.bf16.mxu1 %v3110_v47 }
 0x13d   : > { %895 = vadd.xlane.f32.xlu1 %v894_v41  ;;  %892 = vadd.xlane.f32.xlu0 %v891_v42  ;;  %v532_v41 = vld [vmem:[%s4025_s16 + $0x58] sm:$0xff] }
 0x13e   : > { %2791 = vmatpush3.bf16.msra.mxu1 %v3110_v47  ;;  %v3118_v42 = vld [vmem:[#allocation13 + $0x28] ss:$16 sps:$4 sm:$0xff]   ;;  %v1378_v1 = vpack.c.bf16 %v532_v41, %v531_v40 }
 0x13f   : > { %2808 = vmatprep.subr.bf16.mxu1 %v3097_v48  ;;  %2842 = vmatprep.subr.bf16.mxu0 %v3118_v42  ;;  %v3122_v47 = vld [vmem:[#allocation13 + $0x48] ss:$16 sps:$4 sm:$0xff]  }
 0x140   : > { %2843 = vmatpush3.bf16.msra.mxu0 %v3118_v42 }
 0x141   : > { %845 = vadd.xlane.f32.xlu1 %v826_v13  ;;  %843 = vadd.xlane.f32.xlu0 %v825_v23  ;;  %v918_v13 = vsel %vm658_vm0, %v4167_v8, 0.0  ;;  %v915_v23 = vsel %vm658_vm0, %v4171_v11, 0.0  ;;  %v834_v8 = vmul.f32 %v4267_v10, %v4362_v21 }
 0x142   : > { %2793 = vmatmul.mubr.bf16.vlgmr.msra.gmra.mrb[0].mxu1 %v1374_v58  ;;  %2844 = vmatprep.subr.bf16.mxu0 %v3122_v47  ;;  %v924_v58 = vsel %vm658_vm0, %v4187_v20, 0.0 }
 0x143   : > { %2809 = vmatpush3.bf16.msra.mxu1 %v3097_v48  ;;  %2796 = vmatprep.mubr.bf16.mxu1 %v1375_v60  ;;  %v533_v48 = vld [vmem:[%s4025_s16 + $0x60] sm:$0xff]  ;;  %v930_v60 = vsel %vm658_vm0, %v4196_v24, 0.0 }
 0x144   : > { %2810 = vmatprep.subr.bf16.mxu1 %v3112_v26  ;;  %2845 = vmatpush3.bf16.msra.mxu0 %v3122_v47 }
 0x145   : > { %901 = vadd.xlane.f32.xlu1 %v900_v18  ;;  %898 = vadd.xlane.f32.xlu0 %v897_v19  ;;  %v4365_v18 = vld [vmem:[%s4040_s24 + $0x50] sm:$0xff] }
 0x146   : > { %v3121_v19 = vld [vmem:[#allocation13 + $0x84] ss:$16 sps:$4 sm:$0xff]   ;;  %v833_v11 = vmul.f32 %v4267_v10, %v4365_v18  ;;  %2846 = vmatprep.subr.bf16.mxu0 %v3126_v52 }
 0x147   : > { %2811 = vmatpush3.bf16.msra.mxu1 %v3112_v26  ;;  %v3134_v26 = vld [vmem:[#allocation13 + $0xa8] ss:$16 sps:$4 sm:$0xff]  }
 0x148   : > { %2812 = vmatprep.subr.bf16.mxu1 %v3113_v36  ;;  %2847 = vmatpush3.bf16.msra.mxu0 %v3126_v52 }
 0x149   : > { %849 = vadd.xlane.f32.xlu1 %v828_v49  ;;  %847 = vadd.xlane.f32.xlu0 %v827_v32  ;;  %v534_v49 = vld [vmem:[%s4025_s16 + $0x68] sm:$0xff]  ;;  %v3125_v32 = vld [vmem:[#allocation13 + $0xa4] ss:$16 sps:$4 sm:$0xff]   ;;  %s3651_s16 = smov [#allocation14]  }
 0x14a   : > { %2797 = vmatmul.mubr.bf16.gmra.mrb[4].mxu1 %v1376_v61  ;;  %v1379_v53 = vpack.c.bf16 %v534_v49, %v533_v48  ;;  %2848 = vmatprep.subr.bf16.mxu0 %v3130_v56  ;;  %v4397_v61 = vld [vmem:[%s4040_s24 + $0x70] sm:$0xff]  ;;  %s3559_s23 = sshll.u32 %s3651_s16, 4  ;;  %s3560_s23 = int_to_ptr.vmem [resolvable:$false] %s3559_s23 }
 0x14b   : > { %2813 = vmatpush3.bf16.msra.mxu1 %v3113_v36  ;;  %2800 = vmatprep.mubr.bf16.mxu1 %v1377_v39  ;;  %v837_v24 = vmul.f32 %v4267_v10, %v4397_v61  ;;  %v936_v36 = vsel %vm658_vm0, %v4206_v28, 0.0  ;;  %s3561_s29 = scalar_lea.vmem %s3560_s23, 4096  ;;  %p3562_p4 = scmp.lt.s32.totalorder %s4851_s18, %s3560_s23 }
 0x14c   : > { %2814 = vmatprep.subr.bf16.mxu1 %v3117_v7  ;;  %2849 = vmatpush3.bf16.msra.mxu0 %v3130_v56  ;;  %p3563_p13 = scmp.lt.s32.totalorder %s3561_s29, %s3555_s15 }
 0x14d   : > { %907 = vadd.xlane.f32.xlu1 %v906_v54  ;;  %904 = vadd.xlane.f32.xlu0 %v903_v55  ;;  %v921_v54 = vsel %vm658_vm0, %v4191_v22, 0.0  ;;  %v4380_v55 = vld [vmem:[%s4040_s24 + $0x68] sm:$0xff] }
 0x14e   : > { %v836_v20 = vmul.f32 %v4267_v10, %v4380_v55  ;;  %2850 = vmatprep.subr.bf16.mxu0 %v3134_v26  ;;  %p3564_p7 = por %p3563_p13, %p3562_p4 }
 0x14f   : > { %2815 = vmatpush3.bf16.msra.mxu1 %v3117_v7 }
 0x150   : > { %2816 = vmatprep.subr.bf16.mxu1 %v3121_v19  ;;  %2851 = vmatpush3.bf16.msra.mxu0 %v3134_v26  ;;  %p3565_p2 = pnand %p3564_p7, %p3558_p11 }
 0x151   : > { %853 = vadd.xlane.f32.xlu1 %v830_v15  ;;  %851 = vadd.xlane.f32.xlu0 %v829_v16  ;;  %v4383_v15 = vld [vmem:[%s4040_s24 + $0x60] sm:$0xff] }
 0x152   : > { %2801 = vmatmul.mubr.bf16.gmra.mrb[8].mxu1 %v1378_v1  ;;  %v3129_v16 = vld [vmem:[#allocation13 + $0xc4] ss:$16 sps:$4 sm:$0xff]   ;;  %v835_v22 = vmul.f32 %v4267_v10, %v4383_v15 }
 0x153   : > { %2817 = vmatpush3.bf16.msra.mxu1 %v3121_v19  ;;  %2804 = vmatprep.mubr.bf16.mxu1 %v1379_v53 }
 0x154   : > { %2818 = vmatprep.subr.bf16.mxu1 %v3125_v32 }
 0x155   : > { %913 = vadd.xlane.f32.xlu1 %v912_v62  ;;  %910 = vadd.xlane.f32.xlu0 %v909_v33  ;;  %v3137_v62 = vld [vmem:[#allocation13 + $0xc8] ss:$16 sps:$4 sm:$0xff]   ;;  %v838_v33 = vmul.f32 %v4267_v10, %v4394_v30 }
 0x156   : > { %2852 = vmatprep.subr.bf16.mxu0 %v3137_v62 }
 0x157   : > { %2819 = vmatpush3.bf16.msra.mxu1 %v3125_v32  ;;  %2853 = vmatpush3.bf16.msra.mxu0 %v3137_v62 }
 0x158   : > { %2820 = vmatprep.subr.bf16.mxu1 %v3129_v16  ;;  %2854 = vmatprep.subr.bf16.mxu0 %v3140_v25 }
 0x159   : > { %857 = vadd.xlane.f32.xlu1 %v832_v63  ;;  %855 = vadd.xlane.f32.xlu0 %v831_v0 }
 0x15a   : > { %2805 = vmatmul.mubr.bf16.gmra.mrb[12].mxu1 %v1380_v57 }
 0x15b   : > { %2821 = vmatpush3.bf16.msra.mxu1 %v3129_v16  ;;  %2855 = vmatpush3.bf16.msra.mxu0 %v3140_v25 }
 0x15c   : > { %2822 = vmatprep.subr.bf16.mxu1 %v3133_v17 }
 0x15d   : > { %919 = vadd.xlane.f32.xlu1 %v918_v13  ;;  %916 = vadd.xlane.f32.xlu0 %v915_v23 }
 0x15f   : > { %2823 = vmatpush3.bf16.msra.mxu1 %v3133_v17 }
 0x161   : > { %861 = vadd.xlane.f32.xlu1 %v834_v8  ;;  %859 = vadd.xlane.f32.xlu0 %v833_v11 }
 0x165   : > { %925 = vadd.xlane.f32.xlu1 %v924_v58  ;;  %922 = vadd.xlane.f32.xlu0 %v921_v54 }
 0x169   : > { %865 = vadd.xlane.f32.xlu1 %v836_v20  ;;  %863 = vadd.xlane.f32.xlu0 %v835_v22 }
 0x16d   : > { %931 = vadd.xlane.f32.xlu1 %v930_v60  ;;  %928 = vadd.xlane.f32.xlu0 %v927_v27 }
 0x171   : > { %869 = vadd.xlane.f32.xlu1 %v838_v33  ;;  %867 = vadd.xlane.f32.xlu0 %v837_v24 }
 0x175   : > { %937 = vadd.xlane.f32.xlu1 %v936_v36  ;;  %934 = vadd.xlane.f32.xlu0 %v933_v38 }
 0x186   : > { %v613_v63 = vpop.xlane.xlu1 %612  ;;  %v607_v0 = vpop.xlane.xlu0 %606 }
 0x18a   : > { %v661_v9 = vpop.xlane.xlu1 %660  ;;  %v609_v6 = vpop.xlane.xlu0 %608 }
 0x18b   : > { %v707_v53 = vadd.f32 %v661_v9, %v607_v0 }
 0x18d   : > { %v2584_v57 = vmul.f32 -1.442695, %v707_v53 }
 0x18e   : > { %v664_v10 = vpop.xlane.xlu1 %663  ;;  %v611_v7 = vpop.xlane.xlu0 %610 }
 0x18f   : > { %v708_v52 = vadd.f32 %v664_v10, %v609_v6  ;;  %3143 = vpow2.f32 %v2584_v57 }
 0x191   : > { %v2585_v16 = vmul.f32 -1.442695, %v708_v52 }
 0x192   : > { %v670_v39 = vpop.xlane.xlu1 %669  ;;  %v667_v40 = vpop.xlane.xlu0 %666 }
 0x193   : > { %v710_v56 = vadd.f32 %v670_v39, %v613_v63  ;;  %v709_v20 = vadd.f32 %v667_v40, %v611_v7  ;;  %3145 = vpow2.f32 %v2585_v16 }
 0x195   : > { %v2587_v27 = vmul.f32 -1.442695, %v710_v56  ;;  %v2586_v33 = vmul.f32 -1.442695, %v709_v20 }
 0x196   : > { %v617_v41 = vpop.xlane.xlu1 %616  ;;  %v615_v42 = vpop.xlane.xlu0 %614 }
 0x197   : > { %3147 = vpow2.f32 %v2587_v27 }
 0x198   : > { %3149 = vpow2.f32 %v2586_v33 }
 0x199   : > { %v3144_v7 = vpop.eup %3143 }
 0x19a   : > { %v676_v1 = vpop.xlane.xlu1 %675  ;;  %v673_v13 = vpop.xlane.xlu0 %672 }
 0x19b   : > { %v712_v22 = vadd.f32 %v676_v1, %v617_v41  ;;  %v711_v60 = vadd.f32 %v673_v13, %v615_v42  ;;  %v771_v13 = vadd.f32 1.0, %v3144_v7 }
 0x19d   : > { %v2589_v25 = vmul.f32 -1.442695, %v712_v22  ;;  %v2588_v0 = vmul.f32 -1.442695, %v711_v60  ;;  %v3146_v39 = vpop.eup %3145 }
 0x19e   : > { %v621_v28 = vpop.xlane.xlu1 %620  ;;  %v619_v23 = vpop.xlane.xlu0 %618 }
 0x19f   : > { %3151 = vpow2.f32 %v2589_v25 }
 0x1a0   : > { %3153 = vpow2.f32 %v2588_v0 }
 0x1a2   : > { %v682_v19 = vpop.xlane.xlu1 %681  ;;  %v679_v29 = vpop.xlane.xlu0 %678 }
 0x1a3   : > { %v714_v62 = vadd.f32 %v682_v19, %v621_v28  ;;  %v713_v24 = vadd.f32 %v679_v29, %v619_v23  ;;  %v772_v28 = vadd.f32 1.0, %v3146_v39  ;;  %v3148_v19 = vpop.eup %3147 }
 0x1a4   : > { %v3150_v57 = vpop.eup %3149  ;;  %v774_v60 = vadd.f32 1.0, %v3148_v19 }
 0x1a5   : > { %v2591_v63 = vmul.f32 -1.442695, %v714_v62  ;;  %v2590_v9 = vmul.f32 -1.442695, %v713_v24 }
 0x1a6   : > { %v625_v47 = vpop.xlane.xlu1 %624  ;;  %v623_v8 = vpop.xlane.xlu0 %622 }
 0x1a7   : > { %3155 = vpow2.f32 %v2591_v63 }
 0x1a8   : > { %3157 = vpow2.f32 %v2590_v9 }
 0x1a9   : > { %3159 = vrcp.f32 %v771_v13  ;;  %v3152_v20 = vpop.eup %3151 }
 0x1aa   : > { %v688_v11 = vpop.xlane.xlu1 %687  ;;  %v685_v48 = vpop.xlane.xlu0 %684  ;;  %3161 = vrcp.f32 %v772_v28  ;;  %v776_v24 = vadd.f32 1.0, %v3152_v20 }
 0x1ab   : > { %v716_v40 = vadd.f32 %v688_v11, %v625_v47  ;;  %v715_v41 = vadd.f32 %v685_v48, %v623_v8  ;;  %v3154_v22 = vpop.eup %3153  ;;  %v773_v48 = vadd.f32 1.0, %v3150_v57 }
 0x1ac   : > { %v775_v25 = vadd.f32 1.0, %v3154_v22  ;;  %v3335_v22 = vld [vmem:[%s4033_s14] sm:$0xff] }
 0x1ad   : > { %v2593_v23 = vmul.f32 -1.442695, %v716_v40  ;;  %v2592_v29 = vmul.f32 -1.442695, %v715_v41 }
 0x1ae   : > { %v4407_v49 = vpop.xlane.xlu1 %628  ;;  %v4409_v32 = vpop.xlane.xlu0 %626 }
 0x1af   : > { %3163 = vpow2.f32 %v2593_v23 }
 0x1b0   : > { %3165 = vpow2.f32 %v2592_v29 }
 0x1b1   : > { %v3156_v11 = vpop.eup %3155 }
 0x1b2   : > { %v4411_v50 = vpop.xlane.xlu1 %693  ;;  %v4413_v51 = vpop.xlane.xlu0 %690  ;;  %v778_v0 = vadd.f32 1.0, %v3156_v11 }
 0x1b3   : > { %v3158_v33 = vpop.eup %3157  ;;  %v718_v63 = vadd.f32 %v4411_v50, %v4407_v49  ;;  %v717_v40 = vadd.f32 %v4413_v51, %v4409_v32 }
 0x1b4   : > { %v777_v9 = vadd.f32 1.0, %v3158_v33 }
 0x1b5   : > { %v2595_v13 = vmul.f32 -1.442695, %v718_v63 }
 0x1b6   : > { %v4415_v58 = vpop.xlane.xlu1 %632  ;;  %v4417_v54 = vpop.xlane.xlu0 %630 }
 0x1ba   : > { %v4419_v17 = vpop.xlane.xlu1 %699  ;;  %v4421_v26 = vpop.xlane.xlu0 %696 }
 0x1be   : > { %v4423_v36 = vpop.xlane.xlu1 %636  ;;  %v4425_v38 = vpop.xlane.xlu0 %634 }
 0x1c2   : > { %v4427_v6 = vpop.xlane.xlu1 %705  ;;  %v4429_v10 = vpop.xlane.xlu0 %702 }
 0x1c6   : > { %v842_v42 = vpop.xlane.xlu1 %841  ;;  %v840_v1 = vpop.xlane.xlu0 %839 }
 0x1ca   : > { %v896_v53 = vpop.xlane.xlu1 %895  ;;  %v893_v52 = vpop.xlane.xlu0 %892 }
 0x1cb   : > { %v940_v16 = vadd.f32 %v896_v53, %v842_v42  ;;  %v939_v56 = vadd.f32 %v893_v52, %v840_v1  ;;  %v3160_v1 = vpop.eup %3159  ;;  %v2594_v53 = vmul.f32 -1.442695, %v717_v40 }
 0x1cc   : > { %v3162_v19 = vpop.eup %3161 }
 0x1cd   : > { %v2601_v47 = vmul.f32 -1.442695, %v940_v16  ;;  %v2600_v8 = vmul.f32 -1.442695, %v939_v56  ;;  %v3164_v29 = vpop.eup %3163  ;;  %v720_v56 = vadd.f32 %v4419_v17, %v4415_v58 }
 0x1ce   : > { %v846_v27 = vpop.xlane.xlu1 %845  ;;  %v844_v62 = vpop.xlane.xlu0 %843  ;;  %v780_v16 = vadd.f32 1.0, %v3164_v29 }
 0x1cf   : > { %3167 = vpow2.f32 %v2601_v47  ;;  %v3166_v52 = vpop.eup %3165 }
 0x1d0   : > { %3169 = vpow2.f32 %v2600_v8 }
 0x1d1   : > { %3171 = vrcp.f32 %v774_v60 }
 0x1d2   : > { %3173 = vrcp.f32 %v773_v48  ;;  %v902_v7 = vpop.xlane.xlu1 %901  ;;  %v899_v39 = vpop.xlane.xlu0 %898 }
 0x1d3   : > { %3175 = vrcp.f32 %v776_v24  ;;  %v942_v41 = vadd.f32 %v902_v7, %v846_v27  ;;  %v941_v42 = vadd.f32 %v899_v39, %v844_v62  ;;  %v3336_v7 = vld [vmem:[%s4033_s14 + $0x8] sm:$0xff] }
 0x1d4   : > { %3177 = vrcp.f32 %v775_v25  ;;  %v779_v25 = vadd.f32 1.0, %v3166_v52 }
 0x1d5   : > { %3179 = vrcp.f32 %v778_v0  ;;  %v2603_v28 = vmul.f32 -1.442695, %v942_v41  ;;  %v2602_v23 = vmul.f32 -1.442695, %v941_v42  ;;  %v1165_v32 = vpop.f32.mrb[0].mxu0 }
 0x1d6   : > { %3181 = vrcp.f32 %v777_v9  ;;  %v850_v49 = vpop.xlane.xlu1 %849  ;;  %v848_v50 = vpop.xlane.xlu0 %847  ;;  %v1244_v60 = vsub.f32 %v1165_v32, %v3335_v22  ;;  %v2597_v42 = vmul.f32 -1.442695, %v720_v56 }
 0x1d7   : > { %3183 = vpow2.f32 %v2603_v28  ;;  %v4440_v33 = vpop.f32.mrb[1].mxu0 }
 0x1d8   : > { %3185 = vpow2.f32 %v2602_v23  ;;  %v1260_v0 = vmul.f32 %v3160_v1, %v1244_v60  ;;  %v1169_v63 = vpop.f32.mrb[2].mxu0 }
 0x1d9   : > { %v3168_v57 = vpop.eup %3167  ;;  %3187 = vpow2.f32 %v2595_v13  ;;  %v1245_v39 = vsub.f32 %v1169_v63, %v3336_v7  ;;  %v1171_v40 = vpop.f32.mrb[3].mxu0  ;;  %v719_v13 = vadd.f32 %v4421_v26, %v4417_v54  ;;  %v3337_v54 = vld [vmem:[%s4033_s14 + $0x10] sm:$0xff] }
 0x1da   : > { %v3170_v51 = vpop.eup %3169  ;;  %v1004_v20 = vadd.f32 1.0, %v3168_v57  ;;  %v908_v47 = vpop.xlane.xlu1 %907  ;;  %3189 = vpow2.f32 %v2594_v53  ;;  %v1276_v53 = vadd.f32 %v3335_v22, %v1260_v0  ;;  %v1293_v22 = vsub.f32 %v1171_v40, %v4274_v12 }
 0x1db   : > { %v905_v8 = vpop.xlane.xlu0 %904  ;;  %v4438_v11 = vpop.eup %3171  ;;  %v1003_v48 = vadd.f32 1.0, %v3170_v51  ;;  %v944_v27 = vadd.f32 %v908_v47, %v850_v49  ;;  %v1261_v49 = vmul.f32 %v3162_v19, %v1245_v39  ;;  %v2596_v51 = vmul.f32 -1.442695, %v719_v13 }
 0x1dc   : > { %v943_v62 = vadd.f32 %v905_v8, %v848_v50  ;;  %v3174_v24 = vpop.eup %3173  ;;  %3191 = vrcp.f32 %v1004_v20 }
 0x1dd   : > { %v4442_v58 = vpop.eup %3175  ;;  %3193 = vrcp.f32 %v1003_v48  ;;  %v2605_v17 = vmul.f32 -1.442695, %v944_v27  ;;  %v1277_v52 = vadd.f32 %v3336_v7, %v1261_v49  ;;  %v1175_v57 = vpop.f32.mrb[4].mxu0 }
 0x1de   : > { %v2604_v9 = vmul.f32 -1.442695, %v943_v62  ;;  %v4445_v41 = vpop.eup %3177  ;;  %3195 = vrcp.f32 %v780_v16  ;;  %v854_v28 = vpop.xlane.xlu1 %853  ;;  %v1246_v26 = vsub.f32 %v1175_v57, %v3337_v54  ;;  %v722_v57 = vadd.f32 %v4427_v6, %v4423_v36 }
 0x1df   : > { %v852_v23 = vpop.xlane.xlu0 %851  ;;  %v4449_v1 = vpop.eup %3179  ;;  %3197 = vpow2.f32 %v2605_v17  ;;  %v1530_v27 = vpack.c.bf16 %v1277_v52, %v1276_v53 }
 0x1e0   : > { %v4451_v50 = vpop.eup %3181  ;;  %3199 = vpow2.f32 %v2604_v9  ;;  %v4454_v48 = vpop.f32.mrb[5].mxu0  ;;  %v1262_v62 = vmul.f32 %v3174_v24, %v1246_v26  ;;  %v3338_v9 = vld [vmem:[%s4033_s14 + $0x18] sm:$0xff] }
 0x1e1   : > { %v3184_v29 = vpop.eup %3183  ;;  %3201 = vrcp.f32 %v779_v25  ;;  %v1179_v25 = vpop.f32.mrb[6].mxu0  ;;  %2824 = vmatprep.mubr.bf16.mxu1 %v1530_v27 }
 0x1e2   : > { %v3186_v32 = vpop.eup %3185  ;;  %3203 = vpow2.f32 %v2597_v42  ;;  %v1006_v16 = vadd.f32 1.0, %v3184_v29  ;;  %v914_v56 = vpop.xlane.xlu1 %913  ;;  %v1247_v7 = vsub.f32 %v1179_v25, %v3338_v9  ;;  %v1278_v26 = vadd.f32 %v3337_v54, %v1262_v62 }
 0x1e3   : > { %v911_v20 = vpop.xlane.xlu0 %910  ;;  %v3188_v60 = vpop.eup %3187  ;;  %v1005_v47 = vadd.f32 1.0, %v3186_v32  ;;  %v946_v19 = vadd.f32 %v914_v56, %v854_v28  ;;  %v1292_v28 = vsub.f32 %v4440_v33, %v4277_v37  ;;  %v721_v33 = vadd.f32 %v4429_v10, %v4425_v38 }
 0x1e4   : > { %v945_v8 = vadd.f32 %v911_v20, %v852_v23  ;;  %3205 = vrcp.f32 %v1006_v16  ;;  %v3190_v0 = vpop.eup %3189  ;;  %v1181_v39 = vpop.f32.mrb[7].mxu0  ;;  %v782_v13 = vadd.f32 1.0, %v3188_v60  ;;  %v1263_v24 = vmul.f32 %v4438_v11, %v1247_v7  ;;  %v3340_v7 = vld [vmem:[%s4033_s14 + $0x28] sm:$0xff] }
 0x1e5   : > { %3207 = vrcp.f32 %v1005_v47  ;;  %v2607_v63 = vmul.f32 -1.442695, %v946_v19  ;;  %v781_v52 = vadd.f32 1.0, %v3190_v0  ;;  %v1185_v20 = vpop.f32.mrb[8].mxu0  ;;  %v3339_v19 = vld [vmem:[%s4033_s14 + $0x20] sm:$0xff]  ;;  %v1295_v62 = vsub.f32 %v1181_v39, %v4293_v43 }
 0x1e6   : > { %v2606_v17 = vmul.f32 -1.442695, %v945_v8  ;;  %v3192_v42 = vpop.eup %3191  ;;  %3209 = vpow2.f32 %v2596_v51  ;;  %v858_v23 = vpop.xlane.xlu1 %857  ;;  %v1279_v56 = vadd.f32 %v3338_v9, %v1263_v24  ;;  %v1248_v8 = vsub.f32 %v1185_v20, %v3339_v19 }
 0x1e7   : > { %v856_v49 = vpop.xlane.xlu0 %855  ;;  %v3194_v29 = vpop.eup %3193  ;;  %v1309_v40 = vmul.f32 %v3192_v42, %v1293_v22  ;;  %3211 = vpow2.f32 %v2607_v63 }
 0x1e8   : > { %v4461_v53 = vpop.eup %3195  ;;  %v1308_v32 = vmul.f32 %v3194_v29, %v1292_v28  ;;  %3213 = vpow2.f32 %v2606_v17  ;;  %v1531_v25 = vpack.c.bf16 %v1279_v56, %v1278_v26  ;;  %v2599_v26 = vmul.f32 -1.442695, %v722_v57 }
 0x1e9   : > { %v3198_v51 = vpop.eup %3197  ;;  %v1325_v16 = vadd.f32 %v1309_v40, %v4274_v12  ;;  %3215 = vrcp.f32 %v782_v13  ;;  %v4472_v12 = vpop.f32.mrb[9].mxu0 }
 0x1ea   : > { %v3200_v60 = vpop.eup %3199  ;;  %v1008_v11 = vadd.f32 1.0, %v3198_v51  ;;  %v1324_v47 = vadd.f32 %v1308_v32, %v4277_v37  ;;  %v920_v27 = vpop.xlane.xlu1 %919  ;;  %v1264_v37 = vmul.f32 %v4445_v41, %v1248_v8  ;;  %2825 = vmatmul.mubr.bf16.vlgmr.msra.gmra.mrb[16].mxu1 %v1531_v25 }
 0x1eb   : > { %v917_v36 = vpop.xlane.xlu0 %916  ;;  %v4470_v6 = vpop.eup %3201  ;;  %v1007_v22 = vadd.f32 1.0, %v3200_v60  ;;  %v948_v38 = vadd.f32 %v920_v27, %v858_v23  ;;  %v2598_v23 = vmul.f32 -1.442695, %v721_v33 }
 0x1ec   : > { %v947_v10 = vadd.f32 %v917_v36, %v856_v49  ;;  %v4474_v54 = vpop.eup %3203  ;;  %3217 = vrcp.f32 %v1008_v11  ;;  %v1189_v0 = vpop.f32.mrb[10].mxu0  ;;  %v1671_v63 = vpack.c.bf16 %v1325_v16, %v1324_v47  ;;  %v1294_v49 = vsub.f32 %v4454_v48, %v4296_v44  ;;  %v3341_v47 = vld [vmem:[%s4033_s14 + $0x30] sm:$0xff] }
 0x1ed   : > { %3219 = vrcp.f32 %v1007_v22  ;;  %v2609_v17 = vmul.f32 -1.442695, %v948_v38  ;;  %v1249_v42 = vsub.f32 %v1189_v0, %v3340_v7  ;;  %v1191_v13 = vpop.f32.mrb[11].mxu0  ;;  %v1280_v33 = vadd.f32 %v3339_v19, %v1264_v37 }
 0x1ee   : > { %v2608_v9 = vmul.f32 -1.442695, %v947_v10  ;;  %v3206_v28 = vpop.eup %3205  ;;  %3221 = vrcp.f32 %v781_v52  ;;  %2856 = vmatprep.mubr.bf16.mxu0 %v1671_v63  ;;  %v862_v29 = vpop.xlane.xlu1 %861  ;;  %v1297_v10 = vsub.f32 %v1191_v13, %v4308_v45  ;;  %v3342_v63 = vld [vmem:[%s4033_s14 + $0x38] sm:$0xff] }
 0x1ef   : > { %v860_v39 = vpop.xlane.xlu0 %859  ;;  %v3208_v40 = vpop.eup %3207  ;;  %v1311_v41 = vmul.f32 %v3206_v28, %v1295_v62  ;;  %3223 = vpow2.f32 %v2609_v17  ;;  %v1265_v24 = vmul.f32 %v4442_v58, %v1249_v42  ;;  %v1296_v42 = vsub.f32 %v4472_v12, %v4311_v46 }
 0x1f0   : > { %v3210_v32 = vpop.eup %3209  ;;  %v1310_v51 = vmul.f32 %v3208_v40, %v1294_v49  ;;  %3225 = vpow2.f32 %v2608_v9  ;;  %v1195_v20 = vpop.f32.mrb[12].mxu0 }
 0x1f1   : > { %v3212_v16 = vpop.eup %3211  ;;  %v1327_v52 = vadd.f32 %v1311_v41, %v4293_v43  ;;  %v1281_v56 = vadd.f32 %v3340_v7, %v1265_v24  ;;  %3227 = vpow2.f32 %v2598_v23  ;;  %v1250_v8 = vsub.f32 %v1195_v20, %v3341_v47  ;;  %v4485_v38 = vpop.f32.mrb[13].mxu0  ;;  %v3343_v20 = vld [vmem:[%s4033_s14 + $0x40] sm:$0xff] }
 0x1f2   : > { %v3214_v48 = vpop.eup %3213  ;;  %v1010_v60 = vadd.f32 1.0, %v3212_v16  ;;  %v1326_v11 = vadd.f32 %v1310_v51, %v4296_v44  ;;  %v926_v27 = vpop.xlane.xlu1 %925  ;;  %v784_v41 = vadd.f32 1.0, %v4474_v54 }
 0x1f3   : > { %v923_v58 = vpop.xlane.xlu0 %922  ;;  %v1009_v36 = vadd.f32 1.0, %v3214_v48  ;;  %v950_v22 = vadd.f32 %v926_v27, %v862_v29  ;;  %v1532_v57 = vpack.c.bf16 %v1281_v56, %v1280_v33  ;;  %v4487_v43 = vpop.eup %3215  ;;  %v1266_v62 = vmul.f32 %v4451_v50, %v1250_v8 }
 0x1f4   : > { %v949_v25 = vadd.f32 %v923_v58, %v860_v39  ;;  %3229 = vrcp.f32 %v1010_v60  ;;  %v1672_v19 = vpack.c.bf16 %v1327_v52, %v1326_v11  ;;  %v1199_v44 = vpop.f32.mrb[14].mxu0  ;;  %v783_v52 = vadd.f32 1.0, %v3210_v32 }
 0x1f5   : > { %3231 = vrcp.f32 %v1009_v36  ;;  %v2611_v37 = vmul.f32 -1.442695, %v950_v22  ;;  %v1251_v17 = vsub.f32 %v1199_v44, %v3342_v63  ;;  %v1201_v9 = vpop.f32.mrb[15].mxu0  ;;  %2828 = vmatprep.mubr.bf16.mxu1 %v1532_v57  ;;  %v1282_v51 = vadd.f32 %v3341_v47, %v1266_v62  ;;  %v3344_v57 = vld [vmem:[%s4033_s14 + $0x48] sm:$0xff] }
 0x1f6   : > { %v2610_v0 = vmul.f32 -1.442695, %v949_v25  ;;  %v3218_v7 = vpop.eup %3217  ;;  %3233 = vpow2.f32 %v2599_v26  ;;  %2857 = vmatmul.mubr.bf16.vlgmr.msra.gmra.mrb[32].mxu0 %v1672_v19  ;;  %v866_v28 = vpop.xlane.xlu1 %865  ;;  %v1299_v47 = vsub.f32 %v1201_v9, %v4326_v59  ;;  %v1298_v44 = vsub.f32 %v4485_v38, %v4329_v14 }
 0x1f7   : > { %v864_v23 = vpop.xlane.xlu0 %863  ;;  %v3220_v49 = vpop.eup %3219  ;;  %v1313_v13 = vmul.f32 %v3218_v7, %v1297_v10  ;;  %3235 = vpow2.f32 %v2611_v37  ;;  %v1267_v50 = vmul.f32 %v4449_v1, %v1251_v17 }
 0x1f8   : > { %v4495_v29 = vpop.eup %3221  ;;  %v1312_v39 = vmul.f32 %v3220_v49, %v1296_v42  ;;  %3237 = vpow2.f32 %v2610_v0  ;;  %v1205_v16 = vpop.f32.mrb[16].mxu0 }
 0x1f9   : > { %v3224_v40 = vpop.eup %3223  ;;  %v1329_v24 = vadd.f32 %v1313_v13, %v4308_v45  ;;  %v1283_v12 = vadd.f32 %v3342_v63, %v1267_v50  ;;  %v1252_v48 = vsub.f32 %v1205_v16, %v3343_v20  ;;  %v4501_v58 = vpop.f32.mrb[17].mxu0 }
 0x1fa   : > { %v3226_v26 = vpop.eup %3225  ;;  %v1012_v33 = vadd.f32 1.0, %v3224_v40  ;;  %v1328_v56 = vadd.f32 %v1312_v39, %v4311_v46  ;;  %v932_v1 = vpop.xlane.xlu1 %931 }
 0x1fb   : > { %v929_v60 = vpop.xlane.xlu0 %928  ;;  %v1011_v11 = vadd.f32 1.0, %v3226_v26  ;;  %v952_v8 = vadd.f32 %v932_v1, %v866_v28  ;;  %v1533_v54 = vpack.c.bf16 %v1283_v12, %v1282_v51  ;;  %v3228_v45 = vpop.eup %3227  ;;  %v1268_v32 = vmul.f32 %v4470_v6, %v1252_v48 }
 0x1fc   : > { %v951_v27 = vadd.f32 %v929_v60, %v864_v23  ;;  %3239 = vrcp.f32 %v1012_v33  ;;  %v1209_v36 = vpop.f32.mrb[18].mxu0  ;;  %v1673_v22 = vpack.c.bf16 %v1329_v24, %v1328_v56  ;;  %v785_v50 = vadd.f32 1.0, %v3228_v45  ;;  %v3346_v60 = vld [vmem:[%s4033_s14 + $0x58] sm:$0xff] }
 0x1fd   : > { %3241 = vrcp.f32 %v1011_v11  ;;  %v2613_v46 = vmul.f32 -1.442695, %v952_v8  ;;  %v1253_v19 = vsub.f32 %v1209_v36, %v3344_v57  ;;  %v1211_v10 = vpop.f32.mrb[19].mxu0  ;;  %2829 = vmatmul.mubr.bf16.gmra.mrb[20].mxu1 %v1533_v54  ;;  %v1284_v23 = vadd.f32 %v3343_v20, %v1268_v32 }
 0x1fe   : > { %v2612_v25 = vmul.f32 -1.442695, %v951_v27  ;;  %v3230_v62 = vpop.eup %3229  ;;  %3243 = vrcp.f32 %v784_v41  ;;  %2860 = vmatprep.mubr.bf16.mxu0 %v1673_v22  ;;  %v870_v37 = vpop.xlane.xlu1 %869  ;;  %v3345_v41 = vld [vmem:[%s4033_s14 + $0x50] sm:$0xff]  ;;  %v1300_v54 = vsub.f32 %v4501_v58, %v4347_v35 }
 0x1ff   : > { %v868_v0 = vpop.xlane.xlu0 %867  ;;  %v3232_v63 = vpop.eup %3231  ;;  %v1315_v17 = vmul.f32 %v3230_v62, %v1299_v47  ;;  %3245 = vpow2.f32 %v2613_v46  ;;  %v1269_v6 = vmul.f32 %v4461_v53, %v1253_v19 }
 0x200   : > { %v3234_v9 = vpop.eup %3233  ;;  %v1314_v7 = vmul.f32 %v3232_v63, %v1298_v44  ;;  %3247 = vpow2.f32 %v2612_v25  ;;  %v1215_v13 = vpop.f32.mrb[20].mxu0 }
 0x201   : > { %v3236_v42 = vpop.eup %3235  ;;  %3249 = vrcp.f32 %v783_v52  ;;  %v1331_v28 = vadd.f32 %v1315_v17, %v4326_v59  ;;  %v1285_v49 = vadd.f32 %v3344_v57, %v1269_v6  ;;  %v1254_v24 = vsub.f32 %v1215_v13, %v3345_v41  ;;  %v1217_v33 = vpop.f32.mrb[21].mxu0 }
 0x202   : > { %v3238_v38 = vpop.eup %3237  ;;  %v1014_v39 = vadd.f32 1.0, %v3236_v42  ;;  %v1330_v40 = vadd.f32 %v1314_v7, %v4329_v14  ;;  %v938_v51 = vpop.xlane.xlu1 %937  ;;  %v1301_v59 = vsub.f32 %v1211_v10, %v4344_v34  ;;  %v786_v47 = vadd.f32 1.0, %v3234_v9  ;;  %v3348_v42 = vld [vmem:[%s4033_s14 + $0x68] sm:$0xff] }
 0x203   : > { %v935_v53 = vpop.xlane.xlu0 %934  ;;  %v1013_v12 = vadd.f32 1.0, %v3238_v38  ;;  %v954_v16 = vadd.f32 %v938_v51, %v870_v37  ;;  %v1534_v52 = vpack.c.bf16 %v1285_v49, %v1284_v23  ;;  %v1270_v56 = vmul.f32 %v4495_v29, %v1254_v24  ;;  %v1219_v20 = vpop.f32.mrb[22].mxu0  ;;  %v3347_v37 = vld [vmem:[%s4033_s14 + $0x60] sm:$0xff] }
 0x204   : > { %v953_v26 = vadd.f32 %v935_v53, %v868_v0  ;;  %3251 = vrcp.f32 %v1014_v39  ;;  %v1674_v48 = vpack.c.bf16 %v1331_v28, %v1330_v40  ;;  %v1255_v11 = vsub.f32 %v1219_v20, %v3346_v60  ;;  %v1221_v8 = vpop.f32.mrb[23].mxu0 }
 0x205   : > { %3253 = vrcp.f32 %v1013_v12  ;;  %v2615_v1 = vmul.f32 -1.442695, %v954_v16  ;;  %2832 = vmatprep.mubr.bf16.mxu1 %v1534_v52  ;;  %v1286_v57 = vadd.f32 %v3345_v41, %v1270_v56  ;;  %v1225_v10 = vpop.f32.mrb[24].mxu0  ;;  %v1303_v49 = vsub.f32 %v1221_v8, %v4362_v21 }
 0x206   : > { %v2614_v14 = vmul.f32 -1.442695, %v953_v26  ;;  %v3240_v27 = vpop.eup %3239  ;;  %2861 = vmatmul.mubr.bf16.gmra.mrb[36].mxu0 %v1674_v48  ;;  %v1271_v29 = vmul.f32 %v4487_v43, %v1255_v11  ;;  %v1256_v0 = vsub.f32 %v1225_v10, %v3347_v37  ;;  %v1227_v63 = vpop.f32.mrb[25].mxu0  ;;  %v1302_v13 = vsub.f32 %v1217_v33, %v4365_v18  ;;  %v3350_v11 = vld [vmem:[%s4033_s14 + $0x78] sm:$0xff] }
 0x207   : > { %v3242_v45 = vpop.eup %3241  ;;  %v1317_v32 = vmul.f32 %v3240_v27, %v1301_v59  ;;  %3255 = vpow2.f32 %v2615_v1  ;;  %v1229_v6 = vpop.f32.mrb[26].mxu0  ;;  %v3349_v59 = vld [vmem:[%s4033_s14 + $0x70] sm:$0xff] }
 0x208   : > { %v3244_v36 = vpop.eup %3243  ;;  %v1316_v22 = vmul.f32 %v3242_v45, %v1300_v54  ;;  %3257 = vpow2.f32 %v2614_v14  ;;  %v1287_v19 = vadd.f32 %v3346_v60, %v1271_v29  ;;  %v1231_v28 = vpop.f32.mrb[27].mxu0 }
 0x209   : > { %v3246_v46 = vpop.eup %3245  ;;  %3259 = vrcp.f32 %v785_v50  ;;  %v1333_v25 = vadd.f32 %v1317_v32, %v4344_v34  ;;  %v1257_v34 = vsub.f32 %v1229_v6, %v3348_v42  ;;  %v1305_v45 = vsub.f32 %v1231_v28, %v4380_v55 }
 0x20a   : > { %v3248_v58 = vpop.eup %3247  ;;  %v1016_v62 = vadd.f32 1.0, %v3246_v46  ;;  %v1332_v44 = vadd.f32 %v1316_v22, %v4347_v35  ;;  %3261 = vrcp.f32 %v786_v47  ;;  %v1535_v9 = vpack.c.bf16 %v1287_v19, %v1286_v57  ;;  %v4533_v22 = vld [vmem:[%s4964_s1] sm:$0xf] }
 0x20b   : > { %v3250_v17 = vpop.eup %3249  ;;  %v1015_v43 = vadd.f32 1.0, %v3248_v58  ;;  %v1273_v38 = vmul.f32 %v3244_v36, %v1257_v34 }
 0x20c   : > { %3263 = vrcp.f32 %v1016_v62  ;;  %v1272_v7 = vmul.f32 %v3250_v17, %v1256_v0  ;;  %v1675_v23 = vpack.c.bf16 %v1333_v25, %v1332_v44  ;;  %2833 = vmatmul.mubr.bf16.gmra.mrb[24].mxu1 %v1535_v9  ;;  %v1384_v62 = vrot.slane %v4533_v22, %v588_v3 }
 0x20d   : > { %3265 = vrcp.f32 %v1015_v43  ;;  %v1289_v24 = vadd.f32 %v3348_v42, %v1273_v38  ;;  %v1235_v12 = vpop.f32.mrb[28].mxu0 }
 0x20e   : > { %v3252_v35 = vpop.eup %3251  ;;  %2864 = vmatprep.mubr.bf16.mxu0 %v1675_v23  ;;  %v1288_v41 = vadd.f32 %v3347_v37, %v1272_v7  ;;  %v1258_v56 = vsub.f32 %v1235_v12, %v3349_v59  ;;  %v1237_v20 = vpop.f32.mrb[29].mxu0 }
 0x20f   : > { %v3254_v50 = vpop.eup %3253  ;;  %v1319_v39 = vmul.f32 %v3252_v35, %v1303_v49  ;;  %v1239_v14 = vpop.f32.mrb[30].mxu0  ;;  %v1306_v17 = vsub.f32 %v1237_v20, %v4397_v61 }
 0x210   : > { %v1318_v40 = vmul.f32 %v3254_v50, %v1302_v13  ;;  %v1536_v33 = vpack.c.bf16 %v1289_v24, %v1288_v41  ;;  %v1259_v8 = vsub.f32 %v1239_v14, %v3350_v11  ;;  %v1241_v27 = vpop.f32.mrb[31].mxu0 }
 0x211   : > { %v3256_v51 = vpop.eup %3255  ;;  %v1335_v53 = vadd.f32 %v1319_v39, %v4362_v21  ;;  %v1307_v37 = vsub.f32 %v1241_v27, %v4394_v30 }
 0x212   : > { %v3258_v16 = vpop.eup %3257  ;;  %v1018_v26 = vadd.f32 1.0, %v3256_v51  ;;  %v1334_v52 = vadd.f32 %v1318_v40, %v4365_v18  ;;  %2836 = vmatprep.mubr.bf16.mxu1 %v1536_v33  ;;  %v1304_v18 = vsub.f32 %v1227_v63, %v4383_v15 }
 0x213   : > { %v3260_v48 = vpop.eup %3259  ;;  %v1017_v1 = vadd.f32 1.0, %v3258_v16 }
 0x214   : > { %3267 = vrcp.f32 %v1018_v26  ;;  %v1274_v60 = vmul.f32 %v3260_v48, %v1258_v56  ;;  %v1676_v54 = vpack.c.bf16 %v1335_v53, %v1334_v52  ;;  %v3262_v21 = vpop.eup %3261 }
 0x215   : > { %3269 = vrcp.f32 %v1017_v1  ;;  %v1275_v32 = vmul.f32 %v3262_v21, %v1259_v8  ;;  %v2794_v0 = vpop.f32.mrb[0].mxu1 }
 0x216   : > { %v3264_v47 = vpop.eup %3263  ;;  %2865 = vmatmul.mubr.bf16.gmra.mrb[40].mxu0 %v1676_v54  ;;  %v1290_v25 = vadd.f32 %v3349_v59, %v1274_v60  ;;  %v4542_v43 = vadd.f32 %v2794_v0, %v1384_v62  ;;  %v1467_v6 = vpop.f32.mrb[1].mxu1  ;;  %v4598_v0 = vrot.slane %v4533_v22, %v640_v4 }
 0x217   : > { %v3266_v29 = vpop.eup %3265  ;;  %v1321_v36 = vmul.f32 %v3264_v47, %v1305_v45  ;;  %v1291_v57 = vadd.f32 %v3350_v11, %v1275_v32  ;;  %v2795_v7 = vpop.f32.mrb[2].mxu1 }
 0x218   : > { %v1320_v46 = vmul.f32 %v3266_v29, %v1304_v18  ;;  %v4544_v34 = vadd.f32 %v2795_v7, %v1384_v62  ;;  %v1470_v3 = vpop.f32.mrb[3].mxu1  ;;  %v4589_v29 = vrot.slane %v4533_v22, %v821_v31 }
 0x219   : > { %v1337_v19 = vadd.f32 %v1321_v36, %v4380_v55  ;;  %v1537_v58 = vpack.c.bf16 %v1291_v57, %v1290_v25  ;;  %v1471_v23 = vadd.f32 %v1470_v3, %v1384_v62 }
 0x21a   : > { %v1336_v10 = vadd.f32 %v1320_v46, %v4383_v15  ;;  %v1468_v15 = vadd.f32 %v1467_v6, %v1384_v62  ;;  %v1829_v35 = vpack.c.bf16 %v4544_v34, %v4542_v43  ;;  %v4656_v43 = vld [vmem:[#allocation13 + $0x8c] ss:$16 sps:$4 sm:$0xff]  }
 0x21b   : > { %2837 = vmatmul.mubr.bf16.gmra.mrb[28].mxu1 %v1537_v58  ;;  %v4660_v34 = vld [vmem:[#allocation13 + $0xac] ss:$16 sps:$4 sm:$0xff]  }
 0x21c   : > { %v1677_v44 = vpack.c.bf16 %v1337_v19, %v1336_v10  ;;  %v1828_v13 = vpack.c.bf16 %v1471_v23, %v1468_v15 }
 0x21d   : > { %v2798_v50 = vpop.f32.mrb[4].mxu1 }
 0x21e   : > { %v3268_v63 = vpop.eup %3267  ;;  %2868 = vmatprep.mubr.bf16.mxu0 %v1677_v44  ;;  %2888 = vmatprep.mubr.bf16.mxu1 %v1828_v13  ;;  %v4550_v39 = vadd.f32 %v2798_v50, %v1384_v62  ;;  %v1483_v40 = vpop.f32.mrb[5].mxu1 }
 0x21f   : > { %v3270_v55 = vpop.eup %3269  ;;  %v1323_v9 = vmul.f32 %v3268_v63, %v1307_v37  ;;  %v4552_v41 = vadd.f32 %v1483_v40, %v1384_v62  ;;  %v2799_v24 = vpop.f32.mrb[6].mxu1 }
 0x220   : > { %v1322_v42 = vmul.f32 %v3270_v55, %v1306_v17  ;;  %v4554_v51 = vadd.f32 %v2799_v24, %v1384_v62 }
 0x221   : > { %v1339_v28 = vadd.f32 %v1323_v9, %v4394_v30  ;;  %v1486_v30 = vpop.f32.mrb[7].mxu1 }
 0x222   : > { %v1338_v49 = vadd.f32 %v1322_v42, %v4397_v61  ;;  %v4556_v53 = vadd.f32 %v1486_v30, %v1384_v62  ;;  %v1831_v61 = vpack.c.bf16 %v4554_v51, %v4550_v39  ;;  %v4674_v39 = vld [vmem:[#allocation13 + $0xec] ss:$16 sps:$4 sm:$0xff]  }
 0x224   : > { %v1678_v38 = vpack.c.bf16 %v1339_v28, %v1338_v49  ;;  %v1830_v12 = vpack.c.bf16 %v4556_v53, %v4552_v41  ;;  %v1844_v41 = vld [vmem:[#allocation10] sm:$0xff] }
 0x225   : > { %v2802_v16 = vpop.f32.mrb[8].mxu1 }
 0x226   : > { %2869 = vmatmul.mubr.bf16.gmra.mrb[44].mxu0 %v1678_v38  ;;  %v4562_v26 = vadd.f32 %v2802_v16, %v1384_v62  ;;  %v1499_v52 = vpop.f32.mrb[9].mxu1 }
 0x227   : > { %v4564_v59 = vadd.f32 %v1499_v52, %v1384_v62  ;;  %v2803_v56 = vpop.f32.mrb[10].mxu1 }
 0x228   : > { %v4566_v20 = vadd.f32 %v2803_v56, %v1384_v62  ;;  %v1502_v33 = vpop.f32.mrb[11].mxu1 }
 0x229   : > { %v4568_v48 = vadd.f32 %v1502_v33, %v1384_v62 }
 0x22a   : > { %v1833_v1 = vpack.c.bf16 %v4566_v20, %v4562_v26 }
 0x22b   : > { %v1832_v14 = vpack.c.bf16 %v4568_v48, %v4564_v59  ;;  %v1846_v59 = vld [vmem:[#allocation10 + $0x10] sm:$0xff] }
 0x22d   : > { %v2806_v60 = vpop.f32.mrb[12].mxu1 }
 0x22e   : > { %v4574_v11 = vadd.f32 %v2806_v60, %v1384_v62  ;;  %v1515_v8 = vpop.f32.mrb[13].mxu1 }
 0x22f   : > { %v4576_v27 = vadd.f32 %v1515_v8, %v1384_v62  ;;  %v2807_v54 = vpop.f32.mrb[14].mxu1 }
 0x230   : > { %v4578_v21 = vadd.f32 %v2807_v54, %v1384_v62  ;;  %v1518_v45 = vpop.f32.mrb[15].mxu1 }
 0x231   : > { %v4580_v47 = vadd.f32 %v1518_v45, %v1384_v62 }
 0x232   : > { %v1835_v18 = vpack.c.bf16 %v4578_v21, %v4574_v11  ;;  %v1848_v11 = vld [vmem:[#allocation10 + $0x20] sm:$0xff] }
 0x233   : > { %v1834_v32 = vpack.c.bf16 %v4580_v47, %v4576_v27 }
 0x2bd   : > { %v2826_v36 = vpop.f32.mrb[16].mxu1 }
 0x2be   : > { %v1608_v46 = vpop.f32.mrb[17].mxu1  ;;  %v1617_v57 = vadd.f32 %v2826_v36, %v4589_v29 }
 0x2bf   : > { %v2827_v25 = vpop.f32.mrb[18].mxu1  ;;  %v1609_v58 = vadd.f32 %v1608_v46, %v4589_v29 }
 0x2c0   : > { %v1620_v19 = vadd.f32 %v2827_v25, %v4589_v29  ;;  %v1611_v10 = vpop.f32.mrb[19].mxu1 }
 0x2c1   : > { %v1612_v62 = vadd.f32 %v1611_v10, %v4589_v29 }
 0x2c2   : > { %v1837_v44 = vpack.c.bf16 %v1620_v19, %v1617_v57 }
 0x2c3   : > { %v1836_v37 = vpack.c.bf16 %v1612_v62, %v1609_v58 }
 0x2c5   : > { %2872 = vmatprep.subr.bf16.mxu1 %v1836_v37 }
 0x2c6   : > { %2873 = vmatpush3.bf16.xpose.msra.mxu1 %v1836_v37 }
 0x2c7   : > { %2874 = vmatprep.subr.bf16.mxu1 %v1837_v44 }
 0x2c9   : > { %v2858_v31 = vpop.f32.mrb[32].mxu0 }
 0x2ca   : > { %v1765_v63 = vpop.f32.mrb[33].mxu0  ;;  %v1774_v6 = vadd.f32 %v2858_v31, %v4598_v0 }
 0x2cb   : > { %v2859_v17 = vpop.f32.mrb[34].mxu0  ;;  %v1766_v15 = vadd.f32 %v1765_v63, %v4598_v0 }
 0x2cc   : > { %v1777_v55 = vadd.f32 %v2859_v17, %v4598_v0  ;;  %v1768_v9 = vpop.f32.mrb[35].mxu0 }
 0x2cd   : > { %v1769_v7 = vadd.f32 %v1768_v9, %v4598_v0 }
 0x2ce   : > { %v2110_v42 = vpack.c.bf16 %v1777_v55, %v1774_v6  ;;  %2875 = vmatpush3.bf16.xpose.msra.mxu1 %v1837_v44 }
 0x2cf   : > { %v2109_v3 = vpack.c.bf16 %v1769_v7, %v1766_v15 }
 0x2d0   : > { %v2830_v28 = vpop.f32.mrb[20].mxu1 }
 0x2d1   : > { %2904 = vmatprep.subr.bf16.mxu0 %v2109_v3  ;;  %v1624_v4 = vpop.f32.mrb[21].mxu1  ;;  %v1633_v49 = vadd.f32 %v2830_v28, %v4589_v29 }
 0x2d2   : > { %2905 = vmatpush3.bf16.msra.mxu0 %v2109_v3  ;;  %v2831_v23 = vpop.f32.mrb[22].mxu1  ;;  %v1625_v50 = vadd.f32 %v1624_v4, %v4589_v29 }
 0x2d3   : > { %v1636_v13 = vadd.f32 %v2831_v23, %v4589_v29  ;;  %2906 = vmatprep.subr.bf16.mxu0 %v2110_v42  ;;  %v1627_v38 = vpop.f32.mrb[23].mxu1 }
 0x2d4   : > { %v1628_v40 = vadd.f32 %v1627_v38, %v4589_v29 }
 0x2d5   : > { %v1839_v24 = vpack.c.bf16 %v1636_v13, %v1633_v49 }
 0x2d6   : > { %v1838_v30 = vpack.c.bf16 %v1628_v40, %v1625_v50  ;;  %2907 = vmatpush3.bf16.msra.mxu0 %v2110_v42 }
 0x2d8   : > { %2876 = vmatprep.subr.bf16.mxu1 %v1838_v30 }
 0x2d9   : > { %v2862_v16 = vpop.f32.mrb[36].mxu0  ;;  %2877 = vmatpush3.bf16.xpose.msra.mxu1 %v1838_v30 }
 0x2da   : > { %v1781_v52 = vpop.f32.mrb[37].mxu0  ;;  %2878 = vmatprep.subr.bf16.mxu1 %v1839_v24  ;;  %v1790_v33 = vadd.f32 %v2862_v16, %v4598_v0 }
 0x2db   : > { %v2863_v56 = vpop.f32.mrb[38].mxu0  ;;  %v1782_v54 = vadd.f32 %v1781_v52, %v4598_v0 }
 0x2dc   : > { %v1793_v60 = vadd.f32 %v2863_v56, %v4598_v0  ;;  %v1784_v8 = vpop.f32.mrb[39].mxu0 }
 0x2dd   : > { %v1785_v45 = vadd.f32 %v1784_v8, %v4598_v0 }
 0x2de   : > { %v2112_v36 = vpack.c.bf16 %v1793_v60, %v1790_v33 }
 0x2df   : > { %v2111_v46 = vpack.c.bf16 %v1785_v45, %v1782_v54  ;;  %v2834_v25 = vpop.f32.mrb[24].mxu1 }
 0x2e0   : > { %v1640_v57 = vpop.f32.mrb[25].mxu1  ;;  %v1649_v10 = vadd.f32 %v2834_v25, %v4589_v29 }
 0x2e1   : > { %2908 = vmatprep.subr.bf16.mxu0 %v2111_v46  ;;  %2879 = vmatpush3.bf16.xpose.msra.mxu1 %v1839_v24  ;;  %v2835_v19 = vpop.f32.mrb[26].mxu1  ;;  %v1641_v44 = vadd.f32 %v1640_v57, %v4589_v29  ;;  %v4628_v57 = vld [vmem:[#allocation13 + $0xc] ss:$16 sps:$4 sm:$0xff]  }
 0x2e2   : > { %2909 = vmatpush3.bf16.msra.mxu0 %v2111_v46  ;;  %v1652_v58 = vadd.f32 %v2835_v19, %v4589_v29  ;;  %v1643_v62 = vpop.f32.mrb[27].mxu1  ;;  %v4632_v19 = vld [vmem:[#allocation13 + $0x2c] ss:$16 sps:$4 sm:$0xff]  }
 0x2e3   : > { %2910 = vmatprep.subr.bf16.mxu0 %v2112_v36  ;;  %v1644_v37 = vadd.f32 %v1643_v62, %v4589_v29  ;;  %v1850_v62 = vld [vmem:[#allocation10 + $0x30] sm:$0xff] }
 0x2e4   : > { %v1841_v31 = vpack.c.bf16 %v1652_v58, %v1649_v10  ;;  %v4646_v10 = vld [vmem:[#allocation13 + $0x6c] ss:$16 sps:$4 sm:$0xff]  }
 0x2e5   : > { %v1840_v63 = vpack.c.bf16 %v1644_v37, %v1641_v44 }
 0x2e6   : > { %2911 = vmatpush3.bf16.msra.mxu0 %v2112_v36 }
 0x2e7   : > { %2880 = vmatprep.subr.bf16.mxu1 %v1840_v63 }
 0x2e9   : > { %v2866_v17 = vpop.f32.mrb[40].mxu0  ;;  %2881 = vmatpush3.bf16.xpose.msra.mxu1 %v1840_v63 }
 0x2ea   : > { %v1797_v6 = vpop.f32.mrb[41].mxu0  ;;  %2882 = vmatprep.subr.bf16.mxu1 %v1841_v31  ;;  %v1806_v9 = vadd.f32 %v2866_v17, %v4598_v0  ;;  %v1852_v17 = vld [vmem:[#allocation10 + $0x40] sm:$0xff] }
 0x2eb   : > { %v2867_v55 = vpop.f32.mrb[42].mxu0  ;;  %v1798_v42 = vadd.f32 %v1797_v6, %v4598_v0 }
 0x2ec   : > { %v1809_v15 = vadd.f32 %v2867_v55, %v4598_v0  ;;  %v1800_v7 = vpop.f32.mrb[43].mxu0 }
 0x2ed   : > { %v1801_v3 = vadd.f32 %v1800_v7, %v4598_v0 }
 0x2ee   : > { %v2114_v28 = vpack.c.bf16 %v1809_v15, %v1806_v9  ;;  %v2838_v23 = vpop.f32.mrb[28].mxu1  ;;  %v1853_v15 = vld [vmem:[#allocation10 + $0x48] sm:$0xff] }
 0x2ef   : > { %v2113_v4 = vpack.c.bf16 %v1801_v3, %v1798_v42  ;;  %v1656_v49 = vpop.f32.mrb[29].mxu1  ;;  %v1665_v38 = vadd.f32 %v2838_v23, %v4589_v29  ;;  %v1854_v3 = vld [vmem:[#allocation10 + $0x50] sm:$0xff]  ;;  %v1855_v23 = vld [vmem:[#allocation10 + $0x58] sm:$0xff] }
 0x2f0   : > { %v2839_v13 = vpop.f32.mrb[30].mxu1  ;;  %v1657_v24 = vadd.f32 %v1656_v49, %v4589_v29 }
 0x2f1   : > { %2912 = vmatprep.subr.bf16.mxu0 %v2113_v4  ;;  %2883 = vmatpush3.bf16.xpose.msra.mxu1 %v1841_v31  ;;  %v1668_v50 = vadd.f32 %v2839_v13, %v4589_v29  ;;  %v1659_v40 = vpop.f32.mrb[31].mxu1  ;;  %v1851_v31 = vld [vmem:[#allocation10 + $0x38] sm:$0xff]  ;;  %v1856_v13 = vld [vmem:[#allocation10 + $0x60] sm:$0xff] }
 0x2f2   : > { %2913 = vmatpush3.bf16.msra.mxu0 %v2113_v4  ;;  %v1660_v30 = vadd.f32 %v1659_v40, %v4589_v29 }
 0x2f3   : > { %2914 = vmatprep.subr.bf16.mxu0 %v2114_v28  ;;  %v1843_v16 = vpack.c.bf16 %v1668_v50, %v1665_v38 }
 0x2f4   : > { %v1842_v52 = vpack.c.bf16 %v1660_v30, %v1657_v24  ;;  %v1857_v24 = vld [vmem:[#allocation10 + $0x68] sm:$0xff] }
 0x2f6   : > { %2915 = vmatpush3.bf16.msra.mxu0 %v2114_v28  ;;  %2884 = vmatprep.subr.bf16.mxu1 %v1842_v52 }
 0x2f9   : > { %v2870_v56 = vpop.f32.mrb[44].mxu0  ;;  %2885 = vmatpush3.bf16.xpose.msra.mxu1 %v1842_v52  ;;  %v1858_v52 = vld [vmem:[#allocation10 + $0x70] sm:$0xff] }
 0x2fa   : > { %v1813_v33 = vpop.f32.mrb[45].mxu0  ;;  %2886 = vmatprep.subr.bf16.mxu1 %v1843_v16  ;;  %v1822_v8 = vadd.f32 %v2870_v56, %v4598_v0 }
 0x2fb   : > { %v2871_v60 = vpop.f32.mrb[46].mxu0  ;;  %v1814_v36 = vadd.f32 %v1813_v33, %v4598_v0 }
 0x2fc   : > { %v1825_v54 = vadd.f32 %v2871_v60, %v4598_v0  ;;  %v1816_v45 = vpop.f32.mrb[47].mxu0  ;;  %v1859_v60 = vld [vmem:[#allocation10 + $0x78] sm:$0xff] }
 0x2fd   : > { %v1817_v46 = vadd.f32 %v1816_v45, %v4598_v0  ;;  %v4642_v0 = vld [vmem:[#allocation13 + $0x4c] ss:$16 sps:$4 sm:$0xff]  }
 0x2fe   : > { %v2116_v25 = vpack.c.bf16 %v1825_v54, %v1822_v8 }
 0x2ff   : > { %v2115_v29 = vpack.c.bf16 %v1817_v46, %v1814_v36 }
 0x301   : > { %2916 = vmatprep.subr.bf16.mxu0 %v2115_v29  ;;  %2887 = vmatpush3.bf16.xpose.msra.mxu1 %v1843_v16 }
 0x302   : > { %2917 = vmatpush3.bf16.msra.mxu0 %v2115_v29  ;;  %2968 = vmatprep.subr.bf16.mxu1 %v4628_v57 }
 0x303   : > { %2918 = vmatprep.subr.bf16.mxu0 %v2116_v25 }
 0x306   : > { %2919 = vmatpush3.bf16.msra.mxu0 %v2116_v25 }
 0x307   : > { %2936 = vmatprep.subr.bf16.mxu0 %v4628_v57 }
 0x308   : > { %2889 = vmatmul.mubr.bf16.vlgmr.msra.gmra.mrb[32].mxu1 %v1829_v35  ;;  %v4670_v35 = vld [vmem:[#allocation13 + $0xcc] ss:$16 sps:$4 sm:$0xff]  }
 0x309   : > { %2892 = vmatprep.mubr.bf16.mxu1 %v1830_v12  ;;  %2976 = vmatpush3.bf16.msra.mxu1 %v4628_v57 }
 0x30a   : > { %2969 = vmatprep.subr.bf16.mxu1 %v4632_v19 }
 0x30d   : > { %2977 = vmatpush3.bf16.msra.mxu1 %v4632_v19 }
 0x30e   : > { %2970 = vmatprep.subr.bf16.mxu1 %v4642_v0 }
 0x310   : > { %2893 = vmatmul.mubr.bf16.gmra.mrb[36].mxu1 %v1831_v61  ;;  %v1845_v61 = vld [vmem:[#allocation10 + $0x8] sm:$0xff] }
 0x311   : > { %2896 = vmatprep.mubr.bf16.mxu1 %v1832_v14  ;;  %2978 = vmatpush3.bf16.msra.mxu1 %v4642_v0 }
 0x312   : > { %2971 = vmatprep.subr.bf16.mxu1 %v4646_v10 }
 0x315   : > { %2979 = vmatpush3.bf16.msra.mxu1 %v4646_v10 }
 0x316   : > { %2972 = vmatprep.subr.bf16.mxu1 %v4656_v43 }
 0x318   : > { %2897 = vmatmul.mubr.bf16.gmra.mrb[40].mxu1 %v1833_v1  ;;  %v1847_v1 = vld [vmem:[#allocation10 + $0x18] sm:$0xff] }
 0x319   : > { %2900 = vmatprep.mubr.bf16.mxu1 %v1834_v32  ;;  %2980 = vmatpush3.bf16.msra.mxu1 %v4656_v43 }
 0x31a   : > { %2973 = vmatprep.subr.bf16.mxu1 %v4660_v34 }
 0x31d   : > { %2981 = vmatpush3.bf16.msra.mxu1 %v4660_v34 }
 0x31e   : > { %2974 = vmatprep.subr.bf16.mxu1 %v4670_v35 }
 0x320   : > { %2901 = vmatmul.mubr.bf16.gmra.mrb[44].mxu1 %v1835_v18  ;;  %v1849_v18 = vld [vmem:[#allocation10 + $0x28] sm:$0xff] }
 0x321   : > { %2982 = vmatpush3.bf16.msra.mxu1 %v4670_v35 }
 0x322   : > { %2975 = vmatprep.subr.bf16.mxu1 %v4674_v39 }
 0x325   : > { %2983 = vmatpush3.bf16.msra.mxu1 %v4674_v39 }
 0x3db   : > { %v2890_v51 = vpop.f32.mrb[32].mxu1 }
 0x3dc   : > { %v1894_v53 = vpop.f32.mrb[33].mxu1  ;;  %v4687_v14 = vadd.f32 %v2890_v51, %v1846_v59 }
 0x3dd   : > { %v4682_v12 = vadd.f32 %v1894_v53, %v1844_v41  ;;  %v2891_v26 = vpop.f32.mrb[34].mxu1 }
 0x3de   : > { %v1897_v20 = vpop.f32.mrb[35].mxu1  ;;  %v4690_v27 = vadd.f32 %v2891_v26, %v1847_v1 }
 0x3df   : > { %v4684_v48 = vadd.f32 %v1897_v20, %v1845_v61  ;;  %1957 = vmax.xlane.f32.xlu0 %v4682_v12 }
 0x3e1   : > { %1959 = vmax.xlane.f32.xlu1 %v4684_v48 }
 0x3e3   : > { %v2894_v21 = vpop.f32.mrb[36].mxu1  ;;  %1961 = vmax.xlane.f32.xlu0 %v4687_v14 }
 0x3e4   : > { %v1910_v47 = vpop.f32.mrb[37].mxu1  ;;  %v4699_v63 = vadd.f32 %v2894_v21, %v1850_v62 }
 0x3e5   : > { %v4693_v32 = vadd.f32 %v1910_v47, %v1848_v11  ;;  %v2895_v58 = vpop.f32.mrb[38].mxu1  ;;  %1963 = vmax.xlane.f32.xlu1 %v4690_v27 }
 0x3e6   : > { %v1913_v44 = vpop.f32.mrb[39].mxu1  ;;  %v4702_v6 = vadd.f32 %v2895_v58, %v1851_v31 }
 0x3e7   : > { %v4696_v37 = vadd.f32 %v1913_v44, %v1849_v18  ;;  %1965 = vmax.xlane.f32.xlu0 %v4693_v32 }
 0x3e9   : > { %1967 = vmax.xlane.f32.xlu1 %v4696_v37 }
 0x3eb   : > { %v2898_v55 = vpop.f32.mrb[40].mxu1  ;;  %1969 = vmax.xlane.f32.xlu0 %v4699_v63 }
 0x3ec   : > { %v1926_v9 = vpop.f32.mrb[41].mxu1  ;;  %v4711_v49 = vadd.f32 %v2898_v55, %v1854_v3 }
 0x3ed   : > { %v4705_v7 = vadd.f32 %v1926_v9, %v1852_v17  ;;  %v2899_v42 = vpop.f32.mrb[42].mxu1  ;;  %1971 = vmax.xlane.f32.xlu1 %v4702_v6 }
 0x3ee   : > { %v1929_v28 = vpop.f32.mrb[43].mxu1  ;;  %v4714_v38 = vadd.f32 %v2899_v42, %v1855_v23 }
 0x3ef   : > { %v4708_v4 = vadd.f32 %v1929_v28, %v1853_v15  ;;  %1973 = vmax.xlane.f32.xlu0 %v4705_v7 }
 0x3f1   : > { %1975 = vmax.xlane.f32.xlu1 %v4708_v4 }
 0x3f3   : > { %v2902_v50 = vpop.f32.mrb[44].mxu1  ;;  %1977 = vmax.xlane.f32.xlu0 %v4711_v49 }
 0x3f4   : > { %v1942_v40 = vpop.f32.mrb[45].mxu1  ;;  %v4723_v8 = vadd.f32 %v2902_v50, %v1858_v52 }
 0x3f5   : > { %v4717_v30 = vadd.f32 %v1942_v40, %v1856_v13  ;;  %v2903_v16 = vpop.f32.mrb[46].mxu1  ;;  %1979 = vmax.xlane.f32.xlu1 %v4714_v38 }
 0x3f6   : > { %v1945_v56 = vpop.f32.mrb[47].mxu1  ;;  %v4726_v54 = vadd.f32 %v2903_v16, %v1859_v60 }
 0x3f7   : > { %v4720_v33 = vadd.f32 %v1945_v56, %v1857_v24  ;;  %1981 = vmax.xlane.f32.xlu0 %v4717_v30 }
 0x3f9   : > { %1983 = vmax.xlane.f32.xlu1 %v4720_v33 }
 0x3fb   : > { %1985 = vmax.xlane.f32.xlu0 %v4723_v8 }
 0x3fd   : > { %1987 = vmax.xlane.f32.xlu1 %v4726_v54 }
 0x46c   : > { %v1958_v45 = vpop.xlane.xlu0 %1957 }
 0x46d   : > { %v1989_v36 = vsub.f32 %v4682_v12, %v1958_v45 }
 0x46e   : > { %v1960_v46 = vpop.xlane.xlu1 %1959 }
 0x46f   : > { %v2005_v25 = vmul.f32 1.442695, %v1989_v36  ;;  %v1990_v29 = vsub.f32 %v4684_v48, %v1960_v46 }
 0x470   : > { %v1962_v41 = vpop.xlane.xlu0 %1961 }
 0x471   : > { %3271 = vpow2.f32 %v2005_v25  ;;  %v2007_v51 = vmul.f32 1.442695, %v1990_v29  ;;  %v1991_v53 = vsub.f32 %v4687_v14, %v1962_v41 }
 0x472   : > { %v1964_v61 = vpop.xlane.xlu1 %1963 }
 0x473   : > { %3273 = vpow2.f32 %v2007_v51  ;;  %v2009_v26 = vmul.f32 1.442695, %v1991_v53  ;;  %v1992_v59 = vsub.f32 %v4690_v27, %v1964_v61 }
 0x474   : > { %v1966_v20 = vpop.xlane.xlu0 %1965 }
 0x475   : > { %3275 = vpow2.f32 %v2009_v26  ;;  %v2011_v1 = vmul.f32 1.442695, %v1992_v59  ;;  %v1993_v11 = vsub.f32 %v4693_v32, %v1966_v20 }
 0x476   : > { %v1968_v12 = vpop.xlane.xlu1 %1967 }
 0x477   : > { %3277 = vpow2.f32 %v2011_v1  ;;  %v2013_v21 = vmul.f32 1.442695, %v1993_v11  ;;  %v1994_v48 = vsub.f32 %v4696_v37, %v1968_v12 }
 0x478   : > { %v1970_v47 = vpop.xlane.xlu0 %1969 }
 0x479   : > { %3279 = vpow2.f32 %v2013_v21  ;;  %v2015_v18 = vmul.f32 1.442695, %v1994_v48  ;;  %v1995_v14 = vsub.f32 %v4699_v63, %v1970_v47 }
 0x47a   : > { %v1972_v58 = vpop.xlane.xlu1 %1971 }
 0x47b   : > { %v4737_v62 = vpop.eup %3271  ;;  %3281 = vpow2.f32 %v2015_v18  ;;  %v2017_v27 = vmul.f32 1.442695, %v1995_v14  ;;  %v1996_v44 = vsub.f32 %v4702_v6, %v1972_v58 }
 0x47c   : > { %2037 = vadd.xlane.f32.xlu0 %v4737_v62  ;;  %v1974_v32 = vpop.xlane.xlu0 %1973 }
 0x47d   : > { %v4741_v31 = vpop.eup %3273  ;;  %3283 = vpow2.f32 %v2017_v27  ;;  %v2019_v17 = vmul.f32 1.442695, %v1996_v44  ;;  %v1997_v37 = vsub.f32 %v4705_v7, %v1974_v32 }
 0x47e   : > { %2039 = vadd.xlane.f32.xlu1 %v4741_v31  ;;  %v1976_v55 = vpop.xlane.xlu1 %1975 }
 0x47f   : > { %v4745_v63 = vpop.eup %3275  ;;  %3285 = vpow2.f32 %v2019_v17  ;;  %v2021_v9 = vmul.f32 1.442695, %v1997_v37  ;;  %v1998_v15 = vsub.f32 %v4708_v4, %v1976_v55 }
 0x480   : > { %2041 = vadd.xlane.f32.xlu0 %v4745_v63  ;;  %v1978_v6 = vpop.xlane.xlu0 %1977 }
 0x481   : > { %v4749_v42 = vpop.eup %3277  ;;  %3287 = vpow2.f32 %v2021_v9  ;;  %v2023_v3 = vmul.f32 1.442695, %v1998_v15  ;;  %v1999_v28 = vsub.f32 %v4711_v49, %v1978_v6 }
 0x482   : > { %2043 = vadd.xlane.f32.xlu1 %v4749_v42  ;;  %v1980_v7 = vpop.xlane.xlu1 %1979 }
 0x483   : > { %v4753_v23 = vpop.eup %3279  ;;  %3289 = vpow2.f32 %v2023_v3  ;;  %v2025_v13 = vmul.f32 1.442695, %v1999_v28  ;;  %v2000_v50 = vsub.f32 %v4714_v38, %v1980_v7 }
 0x484   : > { %2045 = vadd.xlane.f32.xlu0 %v4753_v23  ;;  %v1982_v4 = vpop.xlane.xlu0 %1981 }
 0x485   : > { %v4757_v40 = vpop.eup %3281  ;;  %3291 = vpow2.f32 %v2025_v13  ;;  %v2027_v24 = vmul.f32 1.442695, %v2000_v50  ;;  %v2001_v16 = vsub.f32 %v4717_v30, %v1982_v4 }
 0x486   : > { %2047 = vadd.xlane.f32.xlu1 %v4757_v40  ;;  %v1984_v49 = vpop.xlane.xlu1 %1983 }
 0x487   : > { %v4761_v52 = vpop.eup %3283  ;;  %3293 = vpow2.f32 %v2027_v24  ;;  %v2029_v56 = vmul.f32 1.442695, %v2001_v16  ;;  %v2002_v60 = vsub.f32 %v4720_v33, %v1984_v49 }
 0x488   : > { %2049 = vadd.xlane.f32.xlu0 %v4761_v52  ;;  %v1986_v38 = vpop.xlane.xlu0 %1985 }
 0x489   : > { %v4765_v45 = vpop.eup %3285  ;;  %3295 = vpow2.f32 %v2029_v56  ;;  %v2031_v36 = vmul.f32 1.442695, %v2002_v60  ;;  %v2003_v46 = vsub.f32 %v4723_v8, %v1986_v38 }
 0x48a   : > { %2051 = vadd.xlane.f32.xlu1 %v4765_v45  ;;  %v1988_v30 = vpop.xlane.xlu1 %1987 }
 0x48b   : > { %v4769_v25 = vpop.eup %3287  ;;  %3297 = vpow2.f32 %v2031_v36  ;;  %v2033_v29 = vmul.f32 1.442695, %v2003_v46  ;;  %v2004_v41 = vsub.f32 %v4726_v54, %v1988_v30 }
 0x48c   : > { %2053 = vadd.xlane.f32.xlu0 %v4769_v25 }
 0x48d   : > { %v4773_v33 = vpop.eup %3289  ;;  %3299 = vpow2.f32 %v2033_v29  ;;  %v2035_v51 = vmul.f32 1.442695, %v2004_v41 }
 0x48e   : > { %2055 = vadd.xlane.f32.xlu1 %v4773_v33 }
 0x48f   : > { %v4776_v53 = vpop.eup %3291  ;;  %3301 = vpow2.f32 %v2035_v51 }
 0x490   : > { %2057 = vadd.xlane.f32.xlu0 %v4776_v53 }
 0x491   : > { %v4779_v8 = vpop.eup %3293 }
 0x492   : > { %2059 = vadd.xlane.f32.xlu1 %v4779_v8 }
 0x493   : > { %v4782_v61 = vpop.eup %3295 }
 0x494   : > { %2061 = vadd.xlane.f32.xlu0 %v4782_v61 }
 0x495   : > { %v4785_v54 = vpop.eup %3297 }
 0x496   : > { %2063 = vadd.xlane.f32.xlu1 %v4785_v54 }
 0x497   : > { %v4788_v26 = vpop.eup %3299 }
 0x498   : > { %2065 = vadd.xlane.f32.xlu0 %v4788_v26 }
 0x499   : > { %v4791_v59 = vpop.eup %3301 }
 0x49a   : > { %2067 = vadd.xlane.f32.xlu1 %v4791_v59 }
 0x509   : > { %v2038_v20 = vpop.xlane.xlu0 %2037 }
 0x50a   : > { %3303 = vrcp.f32 %v2038_v20 }
 0x50b   : > { %v2040_v1 = vpop.xlane.xlu1 %2039 }
 0x50c   : > { %3305 = vrcp.f32 %v2040_v1 }
 0x50d   : > { %v2042_v11 = vpop.xlane.xlu0 %2041 }
 0x50e   : > { %3307 = vrcp.f32 %v2042_v11 }
 0x50f   : > { %v2044_v12 = vpop.xlane.xlu1 %2043 }
 0x510   : > { %3309 = vrcp.f32 %v2044_v12 }
 0x511   : > { %v2046_v21 = vpop.xlane.xlu0 %2045 }
 0x512   : > { %3311 = vrcp.f32 %v2046_v21 }
 0x513   : > { %v2048_v48 = vpop.xlane.xlu1 %2047 }
 0x514   : > { %v3304_v47 = vpop.eup %3303  ;;  %3313 = vrcp.f32 %v2048_v48 }
 0x515   : > { %v2050_v18 = vpop.xlane.xlu0 %2049  ;;  %v2085_v27 = vmul.f32 %v3304_v47, %v4737_v62 }
 0x516   : > { %v3306_v14 = vpop.eup %3305  ;;  %3315 = vrcp.f32 %v2050_v18 }
 0x517   : > { %v2052_v58 = vpop.xlane.xlu1 %2051  ;;  %v2086_v44 = vmul.f32 %v3306_v14, %v4741_v31 }
 0x518   : > { %v3308_v32 = vpop.eup %3307  ;;  %3317 = vrcp.f32 %v2052_v58 }
 0x519   : > { %v2054_v17 = vpop.xlane.xlu0 %2053  ;;  %v2101_v37 = vpack.c.bf16 %v2086_v44, %v2085_v27  ;;  %v2087_v9 = vmul.f32 %v3308_v32, %v4745_v63 }
 0x51a   : > { %v3310_v55 = vpop.eup %3309  ;;  %3319 = vrcp.f32 %v2054_v17 }
 0x51b   : > { %v2088_v15 = vmul.f32 %v3310_v55, %v4749_v42  ;;  %v2056_v6 = vpop.xlane.xlu1 %2055  ;;  %2920 = vmatprep.mubr.bf16.mxu0 %v2101_v37 }
 0x51c   : > { %v3312_v3 = vpop.eup %3311  ;;  %3321 = vrcp.f32 %v2056_v6 }
 0x51d   : > { %v2058_v28 = vpop.xlane.xlu0 %2057  ;;  %v2102_v7 = vpack.c.bf16 %v2088_v15, %v2087_v9  ;;  %v2089_v31 = vmul.f32 %v3312_v3, %v4753_v23  ;;  %v2225_v3 = vrot.slane %v4533_v22, %v873_v5 }
 0x51e   : > { %v3314_v13 = vpop.eup %3313  ;;  %3323 = vrcp.f32 %v2058_v28 }
 0x51f   : > { %v2060_v62 = vpop.xlane.xlu1 %2059  ;;  %2921 = vmatmul.mubr.bf16.vlgmr.msra.gmra.mrb[48].mxu0 %v2102_v7  ;;  %v2090_v50 = vmul.f32 %v3314_v13, %v4757_v40 }
 0x520   : > { %v3316_v4 = vpop.eup %3315  ;;  %3325 = vrcp.f32 %v2060_v62  ;;  %2937 = vmatpush3.bf16.msra.mxu0 %v4628_v57 }
 0x521   : > { %v2062_v63 = vpop.xlane.xlu0 %2061  ;;  %v2103_v42 = vpack.c.bf16 %v2090_v50, %v2089_v31  ;;  %2938 = vmatprep.subr.bf16.mxu0 %v4632_v19  ;;  %v2091_v49 = vmul.f32 %v3316_v4, %v4761_v52 }
 0x522   : > { %v3318_v24 = vpop.eup %3317  ;;  %3327 = vrcp.f32 %v2062_v63 }
 0x523   : > { %v2064_v16 = vpop.xlane.xlu1 %2063  ;;  %2924 = vmatprep.mubr.bf16.mxu0 %v2103_v42  ;;  %v2092_v56 = vmul.f32 %v3318_v24, %v4765_v45 }
 0x524   : > { %v3320_v60 = vpop.eup %3319  ;;  %3329 = vrcp.f32 %v2064_v16  ;;  %2939 = vmatpush3.bf16.msra.mxu0 %v4632_v19 }
 0x525   : > { %v2066_v23 = vpop.xlane.xlu0 %2065  ;;  %v2104_v40 = vpack.c.bf16 %v2092_v56, %v2091_v49  ;;  %2940 = vmatprep.subr.bf16.mxu0 %v4642_v0  ;;  %v2093_v36 = vmul.f32 %v3320_v60, %v4769_v25 }
 0x526   : > { %v3322_v57 = vpop.eup %3321  ;;  %3331 = vrcp.f32 %v2066_v23 }
 0x527   : > { %v2068_v38 = vpop.xlane.xlu1 %2067  ;;  %2925 = vmatmul.mubr.bf16.gmra.mrb[52].mxu0 %v2104_v40  ;;  %v2094_v46 = vmul.f32 %v3322_v57, %v4773_v33 }
 0x528   : > { %v3324_v30 = vpop.eup %3323  ;;  %3333 = vrcp.f32 %v2068_v38  ;;  %2941 = vmatpush3.bf16.msra.mxu0 %v4642_v0 }
 0x529   : > { %v2105_v52 = vpack.c.bf16 %v2094_v46, %v2093_v36  ;;  %2942 = vmatprep.subr.bf16.mxu0 %v4646_v10  ;;  %v2095_v45 = vmul.f32 %v3324_v30, %v4776_v53 }
 0x52a   : > { %v3326_v19 = vpop.eup %3325 }
 0x52b   : > { %2928 = vmatprep.mubr.bf16.mxu0 %v2105_v52  ;;  %v2096_v29 = vmul.f32 %v3326_v19, %v4779_v8 }
 0x52c   : > { %v3328_v41 = vpop.eup %3327  ;;  %2943 = vmatpush3.bf16.msra.mxu0 %v4646_v10 }
 0x52d   : > { %v2106_v51 = vpack.c.bf16 %v2096_v29, %v2095_v45  ;;  %2944 = vmatprep.subr.bf16.mxu0 %v4656_v43  ;;  %v2097_v33 = vmul.f32 %v3328_v41, %v4782_v61 }
 0x52e   : > { %v3330_v25 = vpop.eup %3329 }
 0x52f   : > { %2929 = vmatmul.mubr.bf16.gmra.mrb[56].mxu0 %v2106_v51  ;;  %v2098_v0 = vmul.f32 %v3330_v25, %v4785_v54 }
 0x530   : > { %v3332_v20 = vpop.eup %3331  ;;  %2945 = vmatpush3.bf16.msra.mxu0 %v4656_v43 }
 0x531   : > { %v2107_v1 = vpack.c.bf16 %v2098_v0, %v2097_v33  ;;  %2946 = vmatprep.subr.bf16.mxu0 %v4660_v34  ;;  %v2099_v8 = vmul.f32 %v3332_v20, %v4788_v26 }
 0x532   : > { %v3334_v53 = vpop.eup %3333 }
 0x533   : > { %2932 = vmatprep.mubr.bf16.mxu0 %v2107_v1  ;;  %v2100_v10 = vmul.f32 %v3334_v53, %v4791_v59 }
 0x534   : > { %2947 = vmatpush3.bf16.msra.mxu0 %v4660_v34 }
 0x535   : > { %v2108_v11 = vpack.c.bf16 %v2100_v10, %v2099_v8  ;;  %2948 = vmatprep.subr.bf16.mxu0 %v4670_v35 }
 0x537   : > { %2933 = vmatmul.mubr.bf16.gmra.mrb[60].mxu0 %v2108_v11 }
 0x538   : > { %2949 = vmatpush3.bf16.msra.mxu0 %v4670_v35 }
 0x539   : > { %2950 = vmatprep.subr.bf16.mxu0 %v4674_v39 }
 0x53c   : > { %2951 = vmatpush3.bf16.msra.mxu0 %v4674_v39 }
 0x5f2   : > { %v2922_v43 = vpop.f32.mrb[48].mxu0 }
 0x5f3   : > { %v2151_v61 = vpop.f32.mrb[49].mxu0 }
 0x5f4   : > { %v2923_v54 = vpop.f32.mrb[50].mxu0 }
 0x5f5   : > { %v2215_v12 = vpack.c.bf16 %v2923_v54, %v2922_v43  ;;  %v2154_v21 = vpop.f32.mrb[51].mxu0 }
 0x5f6   : > { %v2214_v26 = vpack.c.bf16 %v2154_v21, %v2151_v61 }
 0x5f8   : > { %2952 = vmatprep.mubr.bf16.mxu0 %v2214_v26 }
 0x5f9   : > { %2953 = vmatmul.mubr.bf16.vlgmr.msra.gmra.mrb[64].mxu0 %v2215_v12 }
 0x5fa   : > { %v2926_v59 = vpop.f32.mrb[52].mxu0 }
 0x5fb   : > { %v2167_v34 = vpop.f32.mrb[53].mxu0 }
 0x5fc   : > { %v2927_v48 = vpop.f32.mrb[54].mxu0 }
 0x5fd   : > { %v2217_v47 = vpack.c.bf16 %v2927_v48, %v2926_v59  ;;  %v2170_v18 = vpop.f32.mrb[55].mxu0 }
 0x5fe   : > { %v2216_v14 = vpack.c.bf16 %v2170_v18, %v2167_v34 }
 0x600   : > { %2956 = vmatprep.mubr.bf16.mxu0 %v2216_v14 }
 0x601   : > { %2957 = vmatmul.mubr.bf16.gmra.mrb[68].mxu0 %v2217_v47 }
 0x602   : > { %v2930_v35 = vpop.f32.mrb[56].mxu0 }
 0x603   : > { %v2183_v58 = vpop.f32.mrb[57].mxu0 }
 0x604   : > { %v2931_v27 = vpop.f32.mrb[58].mxu0 }
 0x605   : > { %v2219_v39 = vpack.c.bf16 %v2931_v27, %v2930_v35  ;;  %v2186_v44 = vpop.f32.mrb[59].mxu0 }
 0x606   : > { %v2218_v32 = vpack.c.bf16 %v2186_v44, %v2183_v58 }
 0x608   : > { %2960 = vmatprep.mubr.bf16.mxu0 %v2218_v32 }
 0x609   : > { %2961 = vmatmul.mubr.bf16.gmra.mrb[72].mxu0 %v2219_v39 }
 0x60a   : > { %v2934_v17 = vpop.f32.mrb[60].mxu0 }
 0x60b   : > { %v2199_v37 = vpop.f32.mrb[61].mxu0 }
 0x60c   : > { %v2935_v55 = vpop.f32.mrb[62].mxu0 }
 0x60d   : > { %v2221_v9 = vpack.c.bf16 %v2935_v55, %v2934_v17  ;;  %v2202_v15 = vpop.f32.mrb[63].mxu0 }
 0x60e   : > { %v2220_v6 = vpack.c.bf16 %v2202_v15, %v2199_v37 }
 0x610   : > { %2964 = vmatprep.mubr.bf16.mxu1 %v2220_v6 }
 0x611   : > { %2965 = vmatmul.mubr.bf16.vlgmr.msra.gmra.mrb[48].mxu1 %v2221_v9 }
 0x6cc   : > { %v2954_v28 = vpop.f32.mrb[64].mxu0 }
 0x6cd   : > { %v2301_v7 = vadd.f32 %v2954_v28, %v2225_v3  ;;  %v2292_v13 = vpop.f32.mrb[65].mxu0 }
 0x6ce   : > { %v2293_v62 = vadd.f32 %v2292_v13, %v2225_v3  ;;  %v2955_v31 = vpop.f32.mrb[66].mxu0 }
 0x6cf   : > { %2357 = vst [vmem:[%s4829_s21 + $0x10] sm:$0xff] %v2301_v7  ;;  %v2304_v50 = vadd.f32 %v2955_v31, %v2225_v3  ;;  %v2295_v4 = vpop.f32.mrb[67].mxu0 }
 0x6d0   : > { %2355 = vst [vmem:[%s4829_s21] sm:$0xff] %v2293_v62  ;;  %v2296_v2 = vadd.f32 %v2295_v4, %v2225_v3 }
 0x6d1   : > { %2358 = vst [vmem:[%s4829_s21 + $0x18] sm:$0xff] %v2304_v50 }
 0x6d2   : > { %2356 = vst [vmem:[%s4829_s21 + $0x8] sm:$0xff] %v2296_v2 }
 0x6d4   : > { %v2958_v5 = vpop.f32.mrb[68].mxu0 }
 0x6d5   : > { %v2317_v22 = vadd.f32 %v2958_v5, %v2225_v3  ;;  %v2308_v63 = vpop.f32.mrb[69].mxu0 }
 0x6d6   : > { %v2309_v42 = vadd.f32 %v2308_v63, %v2225_v3  ;;  %v2959_v24 = vpop.f32.mrb[70].mxu0 }
 0x6d7   : > { %2361 = vst [vmem:[%s4829_s21 + $0x30] sm:$0xff] %v2317_v22  ;;  %v2320_v16 = vadd.f32 %v2959_v24, %v2225_v3  ;;  %v2311_v49 = vpop.f32.mrb[71].mxu0 }
 0x6d8   : > { %2359 = vst [vmem:[%s4829_s21 + $0x20] sm:$0xff] %v2309_v42  ;;  %v2312_v56 = vadd.f32 %v2311_v49, %v2225_v3 }
 0x6d9   : > { %2362 = vst [vmem:[%s4829_s21 + $0x38] sm:$0xff] %v2320_v16 }
 0x6da   : > { %2360 = vst [vmem:[%s4829_s21 + $0x28] sm:$0xff] %v2312_v56 }
 0x6dc   : > { %v2962_v60 = vpop.f32.mrb[72].mxu0 }
 0x6dd   : > { %v2333_v23 = vadd.f32 %v2962_v60, %v2225_v3  ;;  %v2324_v40 = vpop.f32.mrb[73].mxu0 }
 0x6de   : > { %v2325_v57 = vadd.f32 %v2324_v40, %v2225_v3  ;;  %v2963_v38 = vpop.f32.mrb[74].mxu0 }
 0x6df   : > { %2365 = vst [vmem:[%s4829_s21 + $0x50] sm:$0xff] %v2333_v23  ;;  %v2336_v36 = vadd.f32 %v2963_v38, %v2225_v3  ;;  %v2327_v46 = vpop.f32.mrb[75].mxu0 }
 0x6e0   : > { %2363 = vst [vmem:[%s4829_s21 + $0x40] sm:$0xff] %v2325_v57  ;;  %v2328_v30 = vadd.f32 %v2327_v46, %v2225_v3 }
 0x6e1   : > { %2366 = vst [vmem:[%s4829_s21 + $0x58] sm:$0xff] %v2336_v36 }
 0x6e2   : > { %2364 = vst [vmem:[%s4829_s21 + $0x48] sm:$0xff] %v2328_v30 }
 0x6e4   : > { %v2966_v52 = vpop.f32.mrb[48].mxu1 }
 0x6e5   : > { %v2349_v19 = vadd.f32 %v2966_v52, %v2225_v3  ;;  %v2340_v45 = vpop.f32.mrb[49].mxu1 }
 0x6e6   : > { %v2341_v29 = vadd.f32 %v2340_v45, %v2225_v3  ;;  %v2967_v41 = vpop.f32.mrb[50].mxu1 }
 0x6e7   : > { %2369 = vst [vmem:[%s4829_s21 + $0x70] sm:$0xff] %v2349_v19  ;;  %v2352_v51 = vadd.f32 %v2967_v41, %v2225_v3  ;;  %v2343_v25 = vpop.f32.mrb[51].mxu1 }
 0x6e8   : > { %2367 = vst [vmem:[%s4829_s21 + $0x60] sm:$0xff] %v2341_v29  ;;  %v2344_v33 = vadd.f32 %v2343_v25, %v2225_v3 }
 0x6e9   : > { %2370 = vst [vmem:[%s4829_s21 + $0x78] sm:$0xff] %v2352_v51 }
 0x6ea   : > { %2368 = vst [vmem:[%s4829_s21 + $0x68] sm:$0xff] %v2344_v33 }
 0x6eb   : > { %3568 = shalt.err (!%p3565_p2)
}
 0x6ec   : > { %s3569_s14 = scalar_lea.hbm %s4849_s25, 2048  ;;  %s3573_s27 = scalar_lea.hbm %s4966_s4, 4096 }
 0x6ed   : > { %p3570_p12 = scmp.ne.s32.totalorder %s4849_s25, %s3569_s14  ;;  %p3574_p6 = scmp.lt.u32.totalorder %s4849_s25, %s4966_s4 }
 0x6ee   : > { %p3575_p8 = scmp.lt.u32.totalorder %s3573_s27, %s3569_s14  ;;  %p3577_p10 = scmp.lt.u32.totalorder %s3569_s14, %s4849_s25 }
 0x6ef   : > { %p3571_p3 = pnand %p3570_p12, %p4967_p1 }
 0x6f0   : > { %p3576_p9 = por %p3575_p8, %p3574_p6 }
 0x6f1   : > { %p3572_p0 = pneg %p3571_p3 }
 0x6f2   : > { %p3578_p5 = por %p3577_p10, %p3576_p9 }
 0x6f4   : > { %p3579_p11 = pnand %p3578_p5, %p3572_p0 }
 0x6f6   : > { %3582 = shalt.err (!%p3579_p11)
}
 0x6f7   : > { %s3652_s22 = smov 128   ;;  %s3653_s19 = smov 8  }
 0x6f8   : > { %3004 = dma.vmem_to_hbm [thread:$0]  (%p4967_p1), %s4851_s18, 2048, %s4849_s25, %s2372_s13, %s3652_s22, %s3652_s22, %s3653_s19  }
 0x6f9 PF: > { %s4968_s1 = sld [smem:[#allocation21_spill]]  ;;  %s4969_s21 = sld [smem:[#allocation25_spill]] }
 0x6fa   : > { %p4971_p13 = scmp.ge.s32.totalorder %s3637_s12, 2 }
 0x6ff   : > { %s2401_s5 = sand.u32 1, %s4968_s1   ;;  %p4970_p4 = scmp.ne.s32.totalorder %s4969_s21, 0 }
 0x700   : > { %s2402_s26 = scalar_lea.sflag [#allocation4], %s2401_s5 }
 0x701   : > { %p3030_p7 = pnand %p4971_p13, %p4970_p4 }
 0x703   : > { %3620 = dma.done.wait (!%p3030_p7), %s2402_s26, 2048  }
 0x704   : > { %3622 = vsyncadd (!%p3030_p7), %s2402_s26, 4294965248  ;;  %s4972_s12 = sld [smem:[#allocation22_spill]]  ;;  %s4973_s28 = sld [smem:[#allocation23_spill]] }
 0x705   : > { %s4974_s30 = smov %s3629_s10  ;;  %s4975_s10 = smov %s3633_s11 }
 0x70a   : > { %p29_p2 = scmp.ge.s32.totalorder %s4972_s12, 4   ;;  %s4976_s11 = smov %s4973_s28 }
 0x70c   :  { %31 = sbr.rel (!%p29_p2) target bundleno = 16 (0x10), region = 150 }
 0x713   :  { %2407 = vsyncpa [#allocation3], 1 }
 0x714   :  { %2409 = vsyncpa [#allocation3 + $0x1], 1 }
 0x715   :  { %2410 = vsyncpa [#allocation6], 1 }
 0x716   :  { %2412 = vsyncpa [#allocation6 + $0x1], 1 }
 0x717   :  { %2413 = vsyncpa [#allocation9], 1 }
 0x718   :  { %2415 = vsyncpa [#allocation9 + $0x1], 1 }
 0x719   :  { %2416 = vsyncpa [#allocation12], 1 }
 0x71a   :  { %2417 = vsyncpa [#allocation4], 1 }
 0x71b   :  { %2419 = vsyncpa [#allocation4 + $0x1], 1 }

</bundles_post_ra>
